<compile_context>
chip_gen: v7x
topology: tpu7x:2x2x1
jax: 0.10.0
libtpu: 0.0.40
codegen_flags: <defaults>
</compile_context>

<pallas_src>
import functools

import numpy as np

import jax
import jax.numpy as jnp
from jax.experimental import pallas as pl
from jax.experimental.pallas import tpu as pltpu


def _round_up(x, m):
    return (x + m - 1) // m * m


def _rgc_kernel(blk_s_ref, blk_k_ref, nblk_ref,      # scalar-prefetch (SMEM)
                adj_ref, xv_ref, b_ref,              # inputs
                out_ref,                             # output = resident f32 accumulator
                *, tk, n_c, max_steps, xv_resident):
    i = pl.program_id(0)          # row tile
    t = pl.program_id(1)          # compressed nonzero-block step

    @pl.when(t == 0)
    def _():
        out_ref[...] = jnp.zeros_like(out_ref)

    @pl.when(t < nblk_ref[i])     # skip padded steps (their adj DMA was elided too)
    def _():
        if xv_resident:
            s = blk_s_ref[i * max_steps + t]
            k = blk_k_ref[i * max_steps + t]
            start = pl.multiple_of(s * n_c + k * tk, 128)
            xv_tile = xv_ref[pl.ds(start, tk), :]
        else:
            xv_tile = xv_ref[...]
        a = adj_ref[...]
        if a.dtype != xv_tile.dtype:
            a = a.astype(xv_tile.dtype)     # f32-streamed adjacency: cast in-kernel
        out_ref[...] += jnp.dot(a, xv_tile, preferred_element_type=jnp.float32)

    @pl.when(t == pl.num_programs(1) - 1)
    def _():
        out_ref[...] += b_ref[...]


def build_block_map(A_stack, tm, tk, n_r, n_c):
    """Per-row-tile compressed list of nonzero (support, k) adjacency blocks.

    Returns (blk_s, blk_k, nblk, max_steps) as flattened int32 arrays for scalar
    prefetch.  Padding entries repeat the last valid block so the pipeline elides the
    re-DMA; nblk gates the compute.  Precompute this once per graph (reused across
    layers / steps); it is the only host-synchronising piece, so pass it explicitly
    when calling under jit.
    """
    support, rows, cols = A_stack.shape
    nz = (A_stack != 0)
    if (rows, cols) != (n_r, n_c):
        nz = jnp.pad(nz, ((0, 0), (0, n_r - rows), (0, n_c - cols)))
    nzb = np.asarray(jnp.any(
        nz.reshape(support, n_r // tm, tm, n_c // tk, tk), axis=(2, 4)))
    n_row_tiles, n_col_tiles = nzb.shape[1], nzb.shape[2]
    per_tile = [
        [(s, k) for s in range(support) for k in range(n_col_tiles) if nzb[s, i, k]]
        for i in range(n_row_tiles)
    ]
    max_steps = max(1, max(len(p) for p in per_tile))
    blk_s = np.zeros((n_row_tiles, max_steps), np.int32)
    blk_k = np.zeros((n_row_tiles, max_steps), np.int32)
    nblk = np.zeros((n_row_tiles,), np.int32)
    for i, pairs in enumerate(per_tile):
        nblk[i] = len(pairs)
        for t in range(max_steps):
            s, k = pairs[min(t, len(pairs) - 1)] if pairs else (0, 0)
            blk_s[i, t], blk_k[i, t] = s, k
    return (jnp.asarray(blk_s.reshape(-1)), jnp.asarray(blk_k.reshape(-1)),
            jnp.asarray(nblk), max_steps)


def rgc_layer_forward(A_stack, vertex, W, W_comp, B, *,
                      featureless=False,
                      tm=512, tk=512,
                      compute_dtype=jnp.bfloat16,
                      block_map=None,
                      xv_resident=None,
                      xv_vmem_budget_bytes=16 << 20,
                      adj_buffers=None):
    """Forward of RGCLayer.

    A_stack : (support, N, N) dense form of the sparse adjacencies.  For best
              performance store it persistently in `compute_dtype` (bf16); an f32
              adjacency is streamed as-is and cast in-kernel (never a wrapper pass).
    vertex  : (N, input_dim)
    W       : (input_dim*num_base, h_dim) if W_comp is given, else (input_dim*support, h_dim)
    W_comp  : (support, num_base) or None (num_base <= 0 path)
    B       : (h_dim,)
    adj_buffers : None -> default double-buffered adjacency stream; e.g. 3 on v7x when
                  per-step DMA latency is exposed.
    On v6e-class parts with N <= ~8-16k, passing tk=N makes the adjacency DMA fully
    contiguous and collapses the K dimension of the block map.
    """
    if featureless:
        # TODO(synk): featureless path not implemented.
        raise NotImplementedError("featureless RGCLayer path not implemented")

    support, N, _ = A_stack.shape
    h_dim = W.shape[1]

    # ---- basis recombination (tiny, plain JAX; mirrors the torch code exactly) ----
    if W_comp is not None:
        num_base = W_comp.shape[1]
        input_dim = W.shape[0] // num_base
        # torch.matmul(W_comp (s,nb), W.reshape(nb,in,h)) batches over the leading dim,
        # which requires num_base == input_dim; permute(1,0,2) -> V[s] : (input_dim, h_dim).
        assert num_base == input_dim, \
            "the reference torch forward only runs when num_base == input_dim"
        W_r = W.reshape(num_base, input_dim, h_dim)
        V = jnp.transpose(jnp.einsum("sk,bkh->bsh", W_comp, W_r), (1, 0, 2))
    else:
        input_dim = W.shape[0] // support
        V = W.reshape(support, input_dim, h_dim)

    # ---- reassociation: XV[s] = vertex @ V[s]  (support*N*input_dim*h_dim flops, tiny) ----
    XV = jnp.einsum("nd,sdh->snh", vertex.astype(jnp.float32),
                    V.astype(jnp.float32))              # (support, N, h_dim) f32

    # ---- tiling ----
    tm = min(_round_up(tm, 128), _round_up(N, 128))
    tk = min(_round_up(tk, 128), _round_up(N, 128))
    n_r = _round_up(N, tm)
    n_c = _round_up(N, tk)
    hp = _round_up(h_dim, 128)                          # lane-dense output width
    n_row_tiles = n_r // tm

    # Adjacency streams in the caller's dtype; padded only if N is not a tile multiple.
    adj = A_stack
    if (n_r, n_c) != (N, N):
        adj = jnp.pad(adj, ((0, 0), (0, n_r - N), (0, n_c - N)))

    xv = XV.astype(compute_dtype)
    if (n_c, hp) != (N, h_dim):
        xv = jnp.pad(xv, ((0, 0), (0, n_c - N), (0, hp - h_dim)))
    bias = jnp.pad(B.astype(jnp.float32).reshape(1, h_dim), ((0, 0), (0, hp - h_dim)))

    # ---- block-sparsity map (scalar prefetch) ----
    if block_map is None:
        # NOTE: forces a host sync; precompute once per graph when calling under jit.
        block_map = build_block_map(adj, tm, tk, n_r, n_c)
    blk_s, blk_k, nblk, max_steps = block_map

    # ---- XV residency decision (budget sized for v7x's 64 MiB VMEM) ----
    xv_bytes = support * n_c * hp * jnp.dtype(compute_dtype).itemsize
    if xv_resident is None:
        xv_resident = xv_bytes <= xv_vmem_budget_bytes

    adj_idx = lambda i, t, bs, bk, nb: (bs[i * max_steps + t], i, bk[i * max_steps + t])
    if adj_buffers is None:
        adj_spec = pl.BlockSpec((None, tm, tk), adj_idx)
    else:
        adj_spec = pl.BlockSpec((None, tm, tk), adj_idx,
                                pipeline_mode=pl.Buffered(adj_buffers))

    if xv_resident:
        xv_arg = xv.reshape(support * n_c, hp)          # row index = s*n_c + m
        xv_spec = pl.BlockSpec(memory_space=pltpu.MemorySpace.VMEM)   # one copy, resident
        xv_vmem = xv_bytes
    else:
        xv_arg = xv
        xv_spec = pl.BlockSpec(
            (None, tk, hp),
            lambda i, t, bs, bk, nb: (bs[i * max_steps + t], bk[i * max_steps + t], 0))
        xv_vmem = 2 * tk * hp * jnp.dtype(compute_dtype).itemsize
    bias_spec = pl.BlockSpec(memory_space=pltpu.MemorySpace.VMEM)

    # ---- VMEM budget (v5e's default scoped limit is ~16 MiB; raise explicitly) ----
    adj_vmem = (adj_buffers or 2) * tm * tk * jnp.dtype(adj.dtype).itemsize
    out_vmem = 2 * tm * hp * 4
    est = adj_vmem + xv_vmem + out_vmem + hp * 4
    vmem_limit = int(min(max(1.4 * est + (8 << 20), 32 << 20), 96 << 20))

    kernel = functools.partial(_rgc_kernel, tk=tk, n_c=n_c, max_steps=max_steps,
                               xv_resident=xv_resident)

    out_padded = pl.pallas_call(
        kernel,
        out_shape=jax.ShapeDtypeStruct((n_r, hp), jnp.float32),
        grid_spec=pltpu.PrefetchScalarGridSpec(
            num_scalar_prefetch=3,
            grid=(n_row_tiles, max_steps),
            in_specs=[adj_spec, xv_spec, bias_spec],
            out_specs=pl.BlockSpec((tm, hp), lambda i, t, bs, bk, nb: (i, 0)),
        ),
        compiler_params=pltpu.CompilerParams(
            dimension_semantics=("parallel", "arbitrary"),
            vmem_limit_bytes=vmem_limit),
    )(blk_s, blk_k, nblk, adj, xv_arg, bias)

    # Padded rows [N:n_r] hold only the bias; they are sliced off here and must not be
    # aliased / reused downstream.
    return out_padded[:N, :h_dim]


if __name__ == "__main__":
    # Small-graph example: 1024 nodes, 4 relations, 64-dim features, 64 bases.
    N, input_dim, h_dim, support = 1024, 64, 64, 4
    num_base = input_dim   # the torch 2D x 3D matmul in forward() requires this

    key = jax.random.PRNGKey(0)
    k_a, k_m, k_v, k_w, k_wc = jax.random.split(key, 5)

    # Element-sparse adjacency with genuine block-level sparsity (whole zero 512x512
    # blocks) so the kernel's nonzero-block skipping is actually exercised.
    BLK = 512
    nb = N // BLK
    dense = jax.random.uniform(k_a, (support, N, N), jnp.float32)
    dense = jnp.where(dense > 0.7, dense, 0.0)
    blk_keep = jax.random.bernoulli(k_m, 0.5, (support, nb, nb)).astype(jnp.float32)
    elem_keep = jnp.repeat(jnp.repeat(blk_keep, BLK, axis=1), BLK, axis=2)
    A_f32 = dense * elem_keep

    vertex = jax.random.normal(k_v, (N, input_dim), jnp.float32)

    # Deterministic xavier_uniform parameter init (shapes from __init__); bias = 0.
    bound_w = (6.0 / (input_dim * num_base + h_dim)) ** 0.5
    W = jax.random.uniform(k_w, (input_dim * num_base, h_dim), jnp.float32, -bound_w, bound_w)
    bound_wc = (6.0 / (support + num_base)) ** 0.5
    W_comp = jax.random.uniform(k_wc, (support, num_base), jnp.float32, -bound_wc, bound_wc)
    B = jnp.zeros((h_dim,), jnp.float32)

    # Persistent bf16 adjacency: cast ONCE outside the layer (reused across layers /
    # training steps), so the kernel streams 2 B/elem and the wrapper never re-casts.
    A_bf16 = A_f32.astype(jnp.bfloat16)

    # Main path: pre-cast bf16 adjacency, VMEM-resident XV, default 512x512 tiles.
    out = jax.block_until_ready(rgc_layer_forward(A_bf16, vertex, W, W_comp, B))

    # Alternate path: f32 adjacency streamed + cast in-kernel, XV streamed per block.
    out_alt = jax.block_until_ready(
        rgc_layer_forward(A_f32, vertex, W, W_comp, B, xv_resident=False))

    # ---- references ----
    hi = jax.lax.Precision.HIGHEST
    W_r = W.reshape(num_base, input_dim, h_dim)
    V = jnp.transpose(jnp.einsum("sk,bkh->bsh", W_comp, W_r), (1, 0, 2))

    # Exact torch-semantics f32 reference.
    supports_cat = jnp.concatenate(
        [jnp.matmul(A_f32[i], vertex, precision=hi) for i in range(support)], axis=1)
    ref_f32 = jnp.matmul(supports_cat, V.reshape(input_dim * support, h_dim),
                         precision=hi) + B

    # bf16-consistent reference (same cast points as the kernel path, f32 accumulation).
    XV = jnp.einsum("nd,sdh->snh", vertex, V)
    adj_c = A_bf16.astype(jnp.float32)
    xv_c = XV.astype(jnp.bfloat16).astype(jnp.float32)
    ref_bf16 = jnp.einsum("snm,smh->nh", adj_c, xv_c, precision=hi) + B

    assert out.shape == (N, h_dim) and out.dtype == jnp.float32
    assert jnp.allclose(out, ref_bf16, atol=2e-3, rtol=2e-3), \
        "kernel mismatch vs bf16-consistent reference"
    assert jnp.allclose(out_alt, ref_bf16, atol=2e-3, rtol=2e-3), \
        "streamed-XV / f32-adjacency path mismatch vs bf16-consistent reference"
    assert jnp.allclose(out, ref_f32, atol=0.25, rtol=0.05), \
        "kernel drifted too far from f32 torch-semantics reference"

    print("KERNEL_OK")
</pallas_src>

<mosaic_0001>
module attributes {stable_mosaic.version = 11 : i64} {
  func.func @_rgc_kernel(%arg0: i32, %arg1: i32, %arg2: memref<14xi32, #tpu.memory_space<smem>>, %arg3: memref<14xi32, #tpu.memory_space<smem>>, %arg4: memref<2xi32, #tpu.memory_space<smem>>, %arg5: memref<1x512x512xbf16, #tpu.memory_space<vmem>>, %arg6: memref<4096x128xbf16, #tpu.memory_space<vmem>>, %arg7: memref<1x128xf32, #tpu.memory_space<vmem>>, %arg8: memref<512x128xf32, #tpu.memory_space<vmem>>) attributes {dimension_semantics = [#tpu.dimension_semantics<parallel>, #tpu.dimension_semantics<arbitrary>], iteration_bounds = array<i64: 2, 7>, scalar_prefetch = 3 : i64, scratch_operands = 0 : i64, tpu.core_type = #tpu.core_type<tc>, window_params = [{transform_indices = @transform_0, window_bounds = array<i64: 1, 512, 512>}, {pipeline_mode = #tpu.pipeline_mode<synchronous>, transform_indices = @transform_1, window_bounds = array<i64: 4096, 128>}, {pipeline_mode = #tpu.pipeline_mode<synchronous>, transform_indices = @transform_2, window_bounds = array<i64: 1, 128>}, {transform_indices = @transform_3, window_bounds = array<i64: 512, 128>}]} {
    %c0_i32 = arith.constant 0 : i32
    %0 = arith.cmpi eq, %arg1, %c0_i32 : i32
    %1 = arith.extui %0 : i1 to i32
    %c0_i32_0 = arith.constant 0 : i32
    %2 = arith.cmpi ne, %1, %c0_i32_0 : i32
    scf.if %2 {
      %cst = arith.constant 0.000000e+00 : f32
      %11 = vector.broadcast %cst : f32 to vector<512x128xf32>
      %c0 = arith.constant 0 : index
      %c0_3 = arith.constant 0 : index
      %12 = vector.load %arg8[%c0, %c0_3] : memref<512x128xf32, #tpu.memory_space<vmem>>, vector<512x128xf32>
      tpu.vector_store %arg8[%c0, %c0_3], %11 {strides = array<i32>} : memref<512x128xf32, #tpu.memory_space<vmem>>, vector<512x128xf32>,
    } else {
    }
    %3 = arith.index_cast %arg0 : i32 to index
    %4 = memref.load %arg4[%3] : memref<2xi32, #tpu.memory_space<smem>>
    %5 = arith.cmpi slt, %arg1, %4 : i32
    %6 = arith.extui %5 : i1 to i32
    %c0_i32_1 = arith.constant 0 : i32
    %7 = arith.cmpi ne, %6, %c0_i32_1 : i32
    scf.if %7 {
      %c7_i32 = arith.constant 7 : i32
      %11 = arith.muli %arg0, %c7_i32 : i32
      %12 = arith.addi %11, %arg1 : i32
      %13 = arith.index_cast %12 : i32 to index
      %14 = memref.load %arg2[%13] : memref<14xi32, #tpu.memory_space<smem>>
      %c7_i32_3 = arith.constant 7 : i32
      %15 = arith.muli %arg0, %c7_i32_3 : i32
      %16 = arith.addi %15, %arg1 : i32
      %17 = arith.index_cast %16 : i32 to index
      %18 = memref.load %arg3[%17] : memref<14xi32, #tpu.memory_space<smem>>
      %c1024_i32 = arith.constant 1024 : i32
      %19 = arith.muli %14, %c1024_i32 : i32
      %c512_i32 = arith.constant 512 : i32
      %20 = arith.muli %18, %c512_i32 : i32
      %21 = arith.addi %19, %20 : i32
      %22 = tpu.assume_multiple %21, 128 : i32
      %23 = arith.index_cast %22 : i32 to index
      %c0 = arith.constant 0 : index
      %24 = vector.load %arg6[%23, %c0] : memref<4096x128xbf16, #tpu.memory_space<vmem>>, vector<512x128xbf16>
      %c0_4 = arith.constant 0 : index
      %c0_5 = arith.constant 0 : index
      %c0_6 = arith.constant 0 : index
      %25 = vector.load %arg5[%c0_4, %c0_5, %c0_6] : memref<1x512x512xbf16, #tpu.memory_space<vmem>>, vector<1x512x512xbf16>
      %26 = vector.shape_cast %25 : vector<1x512x512xbf16> to vector<512x512xbf16>
      %c0_7 = arith.constant 0 : index
      %c0_8 = arith.constant 0 : index
      %27 = vector.load %arg8[%c0_7, %c0_8] : memref<512x128xf32, #tpu.memory_space<vmem>>, vector<512x128xf32>
      %cst = arith.constant dense<0.000000e+00> : vector<512x128xf32>
      %28 = tpu.matmul %26, %24, %cst {dimension_numbers = #tpu.dot_dimension_numbers<[1], [0], [0], [1], [0, 0, 1, 1], [], []>} : vector<512x512xbf16>, vector<512x128xbf16>, vector<512x128xf32> -> vector<512x128xf32>
      %29 = arith.addf %27, %28 : vector<512x128xf32>
      %c0_9 = arith.constant 0 : index
      %c0_10 = arith.constant 0 : index
      %30 = vector.load %arg8[%c0_9, %c0_10] : memref<512x128xf32, #tpu.memory_space<vmem>>, vector<512x128xf32>
      tpu.vector_store %arg8[%c0_9, %c0_10], %29 {strides = array<i32>} : memref<512x128xf32, #tpu.memory_space<vmem>>, vector<512x128xf32>,
    } else {
    }
    %c6_i32 = arith.constant 6 : i32
    %8 = arith.cmpi eq, %arg1, %c6_i32 : i32
    %9 = arith.extui %8 : i1 to i32
    %c0_i32_2 = arith.constant 0 : i32
    %10 = arith.cmpi ne, %9, %c0_i32_2 : i32
    scf.if %10 {
      %c0 = arith.constant 0 : index
      %c0_3 = arith.constant 0 : index
      %11 = vector.load %arg8[%c0, %c0_3] : memref<512x128xf32, #tpu.memory_space<vmem>>, vector<512x128xf32>
      %c0_4 = arith.constant 0 : index
      %c0_5 = arith.constant 0 : index
      %12 = vector.load %arg7[%c0_4, %c0_5] : memref<1x128xf32, #tpu.memory_space<vmem>>, vector<1x128xf32>
      %13 = vector.broadcast %12 : vector<1x128xf32> to vector<512x128xf32>
      %14 = arith.addf %11, %13 : vector<512x128xf32>
      %c0_6 = arith.constant 0 : index
      %c0_7 = arith.constant 0 : index
      %15 = vector.load %arg8[%c0_6, %c0_7] : memref<512x128xf32, #tpu.memory_space<vmem>>, vector<512x128xf32>
      tpu.vector_store %arg8[%c0_6, %c0_7], %14 {strides = array<i32>} : memref<512x128xf32, #tpu.memory_space<vmem>>, vector<512x128xf32>,
    } else {
    }
    return
  }
  func.func @transform_0(%arg0: i32, %arg1: i32, %arg2: memref<14xi32, #tpu.memory_space<smem>>, %arg3: memref<14xi32, #tpu.memory_space<smem>>, %arg4: memref<2xi32, #tpu.memory_space<smem>>) -> (i32, i32, i32) {
    %c7_i32 = arith.constant 7 : i32
    %0 = arith.muli %arg0, %c7_i32 : i32
    %1 = arith.addi %0, %arg1 : i32
    %2 = arith.index_cast %1 : i32 to index
    %3 = memref.load %arg2[%2] : memref<14xi32, #tpu.memory_space<smem>>
    %c7_i32_0 = arith.constant 7 : i32
    %4 = arith.muli %arg0, %c7_i32_0 : i32
    %5 = arith.addi %4, %arg1 : i32
    %6 = arith.index_cast %5 : i32 to index
    %7 = memref.load %arg3[%6] : memref<14xi32, #tpu.memory_space<smem>>
    %c0_i32 = arith.constant 0 : i32
    return %3, %arg0, %7 : i32, i32, i32
  }
  func.func @transform_1(%arg0: i32, %arg1: i32, %arg2: memref<14xi32, #tpu.memory_space<smem>>, %arg3: memref<14xi32, #tpu.memory_space<smem>>, %arg4: memref<2xi32, #tpu.memory_space<smem>>) -> (i32, i32) {
    %c0_i32 = arith.constant 0 : i32
    %c0_i32_0 = arith.constant 0 : i32
    %c0_i32_1 = arith.constant 0 : i32
    return %c0_i32, %c0_i32_0 : i32, i32
  }
  func.func @transform_2(%arg0: i32, %arg1: i32, %arg2: memref<14xi32, #tpu.memory_space<smem>>, %arg3: memref<14xi32, #tpu.memory_space<smem>>, %arg4: memref<2xi32, #tpu.memory_space<smem>>) -> (i32, i32) {
    %c0_i32 = arith.constant 0 : i32
    %c0_i32_0 = arith.constant 0 : i32
    %c0_i32_1 = arith.constant 0 : i32
    return %c0_i32, %c0_i32_0 : i32, i32
  }
  func.func @transform_3(%arg0: i32, %arg1: i32, %arg2: memref<14xi32, #tpu.memory_space<smem>>, %arg3: memref<14xi32, #tpu.memory_space<smem>>, %arg4: memref<2xi32, #tpu.memory_space<smem>>) -> (i32, i32) {
    %c0_i32 = arith.constant 0 : i32
    %c0_i32_0 = arith.constant 0 : i32
    return %arg0, %c0_i32 : i32, i32
  }
}

</mosaic_0001>

<bundles_post_ra>
// kernel: tpu_custom_call.1
= control target key start
LH: loop header
LB: loop body
LE: loop exit
PB: predicated region body
PF: predicated region fallthrough
CT: control target
= control target key end

     0   :  { %s4338_s0 = inlined_call_operand.hbm [shape: s32[14], index: 0, kind: input, shape index: {}]   ;;  %s4339_s3 = inlined_call_operand.hbm [shape: bf16[4,1024,1024], index: 3, kind: input, shape index: {}]   ;;  %s4340_s4 = inlined_call_operand.hbm [shape: bf16[4096,128], index: 4, kind: input, shape index: {}]   ;;  %s4341_s5 = inlined_call_operand.hbm [shape: f32[1,128], index: 5, kind: input, shape index: {}]   ;;  %s4342_s6 = inlined_call_operand.hbm [shape: f32[1024,128], index: 6, kind: output, shape index: {}]   ;;  %s4343_s1 = inlined_call_operand.hbm [shape: s32[14], index: 1, kind: input, shape index: {}]   ;;  %s4344_s2 = inlined_call_operand.hbm [shape: s32[2], index: 2, kind: input, shape index: {}]  }
   0x1   :  { %4357 = sst [smem:[#allocation28_spill]] %s4340_s4  ;;  %s3031_s23 = scalar_lea.hbm %s4338_s0, 16 }
   0x2   :  { %4358 = sst [smem:[#allocation29_spill]] %s4341_s5  ;;  %p3032_p0 = scmp.ne.s32.totalorder %s4338_s0, %s3031_s23 }
   0x3   :  { %4359 = sst [smem:[#allocation30_spill]] %s4342_s6  ;;  %p3035_p1 = scmp.lt.u32.totalorder %s3031_s23, %s4338_s0 }
   0x5   :  { %p3037_p2 = pnand %p3035_p1, %p3032_p0 }
   0x7   :  { %3040 = shalt.err (!%p3037_p2)  }
   0x8   :  { %s3277_s28 = smov [#allocation3]   ;;  %s3041_s9 = scalar_lea.hbm %s4343_s1, 16 }
   0x9   :  { %12 = dma.hbm_to_smem %s4338_s0, 16, %s3277_s28, [#allocation2] }
   0xa   :  { %p3042_p3 = scmp.ne.s32.totalorder %s4343_s1, %s3041_s9  ;;  %p3045_p4 = scmp.lt.u32.totalorder %s3041_s9, %s4343_s1 }
   0xc   :  { %p3047_p5 = pnand %p3045_p4, %p3042_p3 }
   0xe   :  { %3050 = shalt.err (!%p3047_p5)  }
   0xf   :  { %s3278_s14 = smov [#allocation4]   ;;  %s3051_s18 = scalar_lea.hbm %s4344_s2, 16 }
  0x10   :  { %14 = dma.hbm_to_smem %s4343_s1, 16, %s3278_s14, [#allocation2] }
  0x11   :  { %p3052_p6 = scmp.ne.s32.totalorder %s4344_s2, %s3051_s18  ;;  %p3055_p7 = scmp.lt.u32.totalorder %s3051_s18, %s4344_s2 }
  0x13   :  { %p3057_p8 = pnand %p3055_p7, %p3052_p6 }
  0x15   :  { %3060 = shalt.err (!%p3057_p8)  }
  0x16   :  { %s3279_s23 = smov [#allocation5]  }
  0x17   :  { %16 = dma.hbm_to_smem %s4344_s2, 16, %s3279_s23, [#allocation2] }
  0x18   :  { %3219 = dma.done.wait [#allocation2], 48 }
  0x19   :  { %3220 = vsyncadd [#allocation2], 4294967248 }
  0x1a   :  { %18 = sfence }
  0x1b   :  { %19 = vsyncpa [#allocation7], 0 }
  0x1c   :  { %21 = vsyncpa [#allocation7 + $0x1], 0 }
  0x1d   :  { %22 = vsyncpa [#allocation10], 0 }
  0x1e   :  { %23 = vsyncpa [#allocation8], 0 }
  0x1f   :  { %25 = vsyncpa [#allocation8 + $0x1], 0  ;;  %s3364_s1 = smov 0   ;;  %s3366_s26 = smov 0  }
  0x20   :  { %s3368_s27 = smov 0   ;;  %s3370_s28 = smov 0  }
  0x21   :  { %s3372_s29 = smov 0   ;;  %s3374_s30 = smov 0  }
  0x22   :  { %s3376_s2 = smov 0   ;;  %s3378_s7 = smov 0  }
  0x23   :  { %s3380_s8 = smov 0   ;;  %s3382_s9 = smov 0  }
  0x24   :  { %s3384_s10 = smov 0  }
  0x25 LB: > { %4360 = sst [smem:[#allocation21_spill]] %s3235_s1  ;;  %s2473_s11 = sadd.s32 4294967295, %s3275_s10   ;;  %s3275_s10 = sphi %s3384_s10, %s31_s10   ;;  %s3271_s9 = sphi %s3382_s9, %s4402_s9   ;;  %s3267_s8 = sphi %s3380_s8, %s4392_s8   ;;  %s3263_s7 = sphi %s3378_s7, %s4401_s7   ;;  %s3259_s2 = sphi %s3376_s2, %s4400_s2   ;;  %s3255_s30 = sphi %s3374_s30, %s4399_s30   ;;  %s3251_s29 = sphi %s3372_s29, %s4398_s29   ;;  %s3247_s28 = sphi %s3370_s28, %s4397_s28   ;;  %s3243_s27 = sphi %s3368_s27, %s4396_s27   ;;  %s3239_s26 = sphi %s3366_s26, %s4395_s26   ;;  %s3235_s1 = sphi %s3364_s1, %s4394_s1  }
  0x26   : > { %4361 = sst [smem:[#allocation22_spill]] %s3243_s27  ;;  %p75_p9 = scmp.ne.s32.totalorder %s3251_s29, %s3247_s28 }
  0x27   : > { %4362 = sst [smem:[#allocation23_spill]] %s3267_s8  ;;  %s2474_s12 = sadd.s32 4294967294, %s3275_s10  }
  0x28   : > { %p3420_p10 = scmp.eq.s32.totalorder %s2473_s11, 0  ;;  %p140_p11 = scmp.ne.s32.totalorder %s3243_s27, %s3239_s26 }
  0x29   : > { %p141_p13 = scmp.eq.s32.totalorder %s2473_s11, 13  ;;  %p146_p0 = scmp.ne.s32.totalorder %s3239_s26, %s3235_s1 }
  0x2a   : > { %s4363_s13 = scalar_select %p3420_p10, 1, 0 }
  0x2b   : > { %p3428_p12 = por %p3420_p10, %p75_p9  ;;  %p147_p1 = scmp.eq.s32.totalorder %s2474_s12, 13 }
  0x2c   : > { %p3434_p2 = por %p141_p13, %p140_p11  ;;  %p2475_p3 = scmp.ge.s32.totalorder %s3275_s10, 1 }
  0x2d   : > { %s4364_s14 = scalar_select %p3428_p12, 1, 0 }
  0x2e   : > { %s4365_s15 = scalar_select %p3434_p2, 1, 0 }
  0x2f   : > { %p3439_p4 = por %p147_p1, %p146_p0  ;;  %p154_p5 = scmp.lt.s32.totalorder %s3275_s10, 15 }
  0x30   : > { %s3280_s17 = smov [#allocation9]   ;;  %s3281_s20 = smov [#allocation11]  }
  0x31   : > { %s4366_s16 = scalar_select %p3439_p4, 1, 0 }
  0x32   : > { %p3444_p6 = pnand %p2475_p3, %p154_p5  ;;  %s166_s18 = sshll.u32 %s3280_s17, 4  ;;  %s167_s18 = int_to_ptr.vmem [resolvable:$true] %s166_s18 }
  0x33   : > { %4367 = sst [smem:[#allocation24_spill]] %s4366_s16  ;;  %s180_s21 = sshll.u32 %s3281_s20, 4  ;;  %s3456_s21 = int_to_ptr.vmem [resolvable:$true] %s180_s21 }
  0x34   : > { %s4368_s0 = scalar_select %p3444_p6, 1, 0 }
  0x35   : > { %p2680_p7 = pneg %p3444_p6  ;;  %s4370_s4 = sld [smem:[#allocation28_spill]] }
  0x37   : > { %p3452_p8 = pnand %p2680_p7, %p3420_p10 }
  0x39   : > { %p3063_p11 = pneg %p3452_p8 }
  0x3b   : > { %s3061_s24 = scalar_lea.hbm %s4370_s4, 32768 }
  0x3c   : > { %p3062_p9 = scmp.ne.s32.totalorder %s4370_s4, %s3061_s24  ;;  %p3068_p1 = scmp.lt.u32.totalorder %s3061_s24, %s4370_s4 }
  0x3e   : > { %p3064_p13 = pnand %p3063_p11, %p3062_p9 }
  0x40   : > { %p3065_p0 = pneg %p3064_p13 }
  0x42   : > { %p3070_p3 = pnand %p3068_p1, %p3065_p0 }
  0x44   : > { %3073 = shalt.err (!%p3070_p3)
}
  0x45   : > { %s3074_s17 = scalar_lea.vmem %s167_s18, 32768  ;;  %p3082_p2 = scmp.lt.s32.totalorder %s167_s18, %s167_s18 }
  0x46   : > { %p3075_p5 = scmp.ne.s32.totalorder %s167_s18, %s3074_s17  ;;  %p3083_p10 = scmp.lt.s32.totalorder %s3074_s17, %s3074_s17 }
  0x48   : > { %p3077_p7 = pnand %p3075_p5, %p3063_p11  ;;  %p3084_p12 = por %p3083_p10, %p3082_p2 }
  0x4a   : > { %p3078_p4 = pneg %p3077_p7 }
  0x4c   : > { %p3085_p6 = pnand %p3084_p12, %p3078_p4 }
  0x4e   : > { %3088 = shalt.err (!%p3085_p6)
}
  0x4f   : > { %s3282_s20 = smov 64   ;;  %s3283_s22 = smov 4  }
  0x50   : > { %2683 = dma.hbm_to_vmem [thread:$0]  (!%p3452_p8), %s4370_s4, 32768, %s167_s18, [#allocation10], %s3282_s20, %s3282_s20, %s3283_s22  }
  0x51   : > { %s4371_s5 = sld [smem:[#allocation29_spill]] }
  0x57   : > { %s3089_s11 = scalar_lea.hbm %s4371_s5, 16 }
  0x58   : > { %p3090_p9 = scmp.ne.s32.totalorder %s4371_s5, %s3089_s11  ;;  %p3096_p2 = scmp.lt.u32.totalorder %s3089_s11, %s4371_s5 }
  0x5a   : > { %p3092_p10 = pnand %p3090_p9, %p3063_p11 }
  0x5c   : > { %p3093_p12 = pneg %p3092_p10 }
  0x5e   : > { %p3098_p4 = pnand %p3096_p2, %p3093_p12 }
  0x60   : > { %3101 = shalt.err (!%p3098_p4)
}
  0x61   : > { %s3102_s18 = scalar_lea.vmem %s3456_s21, 16  ;;  %s3109_s16 = scalar_lea.vmem %s3456_s21, 32 }
  0x62   : > { %p3103_p6 = scmp.ne.s32.totalorder %s3456_s21, %s3102_s18  ;;  %p3110_p1 = scmp.lt.s32.totalorder %s3456_s21, %s3456_s21 }
  0x63   : > { %p3111_p3 = scmp.lt.s32.totalorder %s3109_s16, %s3102_s18 }
  0x64   : > { %p3105_p13 = pnand %p3103_p6, %p3063_p11 }
  0x65   : > { %p3112_p5 = por %p3111_p3, %p3110_p1 }
  0x66   : > { %p3106_p0 = pneg %p3105_p13 }
  0x68   : > { %p3113_p7 = pnand %p3112_p5, %p3106_p0 }
  0x6a   : > { %3116 = shalt.err (!%p3113_p7)
}
  0x6b   : > { %2686 = dma.hbm_to_vmem [thread:$0]  (!%p3452_p8), %s4371_s5, 16, %s3456_s21, [#allocation10]  }
  0x6c   : > { %s40_s22 = sadd.s32 1, %s3267_s8  ;;  %s43_s19 = sadd.s32 1, %s3271_s9 }
  0x6d   : > { %p41_p11 = scmp.ge.s32.totalorder %s40_s22, 7  ;;  %p69_p9 = scmp.ne.s32.totalorder %s3255_s30, %s3251_s29 }
  0x6e   : > { %p70_p10 = scmp.eq.s32.totalorder %s3275_s10, 0  ;;  %s47_s24 = smul.u32 7, %s3271_s9 }
  0x6f   : > { %s4404_s19 = smov (!%p41_p11, %s43_s19), %s3271_s9  ;;  %s4406_s22 = smov (%p41_p11, %s40_s22), 0 }
  0x70   : > { %4372 = sst [smem:[#allocation25_spill]] %s4406_s22  ;;  %s130_s25 = sadd.s32 1, %s3243_s27 }
  0x71   : > { %p45_p12 = scmp.ge.s32.totalorder %s4404_s19, 2  ;;  %p3517_p2 = por %p70_p10, %p69_p9 }
  0x72   : > { %s48_s21 = sadd.s32 %s3267_s8, %s47_s24  ;;  %p2701_p8 = scmp.lt.s32.totalorder %s3275_s10, 14 }
  0x73   : > { %s4408_s19 = smov (%p45_p12, %s4404_s19), 0  ;;  %s49_s11 = sld [smem:[#allocation3 + %s48_s21]] }
  0x74   : > { %4374 = sst [smem:[#allocation26_spill]] %s4408_s19  ;;  %s51_s12 = smul.u32 7, %s4408_s19 }
  0x75   : > { %s56_s17 = ssub.s32 %s3271_s9, %s4408_s19  ;;  %s50_s18 = sld [smem:[#allocation4 + %s48_s21]] }
  0x76   : > { %p128_p4 = scmp.eq.s32.totalorder %s56_s17, 0  ;;  %s52_s16 = sadd.s32 %s51_s12, %s4406_s22 }
  0x77   : > { %s53_s20 = sld [smem:[#allocation3 + %s52_s16]]  ;;  %s4410_s21 = smov (!%p3517_p2, %s48_s21), 0 }
  0x78   : > { %s54_s24 = sld [smem:[#allocation4 + %s52_s16]]  ;;  %s4414_s21 = smov (!%p2701_p8, %s4410_s21), 0 }
  0x79   : > { %s3531_s23 = scalar_select %p128_p4, %s3243_s27, %s130_s25  }
  0x7a   : > { %s2668_s4 = scalar_select %p3517_p2, [#allocation3], [#allocation13] }
  0x7b   : > { %4375 = sst [smem:[#allocation27_spill]] %s3531_s23  ;;  %s4376_s19 = sand.u32 1, %s3255_s30  }
  0x7c   : > { %s4412_s4 = smov (!%p2701_p8, %s2668_s4), [#allocation15]  ;;  %s2479_s22 = sshll.u32 %s4376_s19, 10 }
  0x7d   : > { %s55_s12 = ssub.s32 %s49_s11, %s53_s20  ;;  %s198_s6 = sld [smem:[%s4412_s4 + %s4414_s21]] }
  0x7e   : > { %s58_s5 = ssub.s32 %s50_s18, %s54_s24  ;;  %s57_s1 = sor.u32 %s56_s17, %s55_s12 }
  0x7f   : > { %s59_s8 = sor.u32 %s58_s5, %s57_s1  ;;  %p3547_p13 = pnand %p2701_p8, %p3517_p2 }
  0x80   : > { %p60_p6 = scmp.eq.s32.totalorder %s59_s8, 0  ;;  %s4378_s23 = sadd.s32 1, %s3255_s30 }
  0x81   : > { %s2670_s16 = scalar_select %p3517_p2, [#allocation4], [#allocation14] }
  0x82   : > { %s3556_s27 = scalar_select %p60_p6, %s3255_s30, %s4378_s23  }
  0x83   : > { %s4416_s16 = smov (!%p2701_p8, %s2670_s16), [#allocation16]  ;;  %s195_s5 = scalar_lea.vmem [#allocation6], %s2479_s22 }
  0x84   : > { %s199_s19 = sld [smem:[%s4416_s16 + %s4414_s21]]  ;;  %s211_s4 = sshll.u32 %s195_s5, 4  ;;  %s3561_s4 = int_to_ptr.vmem [resolvable:$true] %s211_s4 }
  0x85   : > { %s2662_s8 = sshll.u32 %s3271_s9, 9  ;;  %s2483_s11 = sshll.u32 %s198_s6, 10 }
  0x86   : > { %s4379_s12 = sand.u32 1, %s3255_s30   ;;  %p3119_p1 = pneg %p3547_p13 }
  0x87   : > { %s3570_s22 = scalar_lea.sflag [#allocation7], %s4379_s12 }
  0x8a   : > { %s2481_s17 = sshll.u32 %s199_s19, 2  ;;  %s3122_s19 = scalar_lea.hbm %s4339_s3, 262144 }
  0x8b   : > { %s206_s18 = sadd.s32 %s2662_s8, %s2481_s17 }
  0x8c   : > { %s208_s1 = sadd.s32 %s2483_s11, %s206_s18 }
  0x8d   : > { %s2484_s20 = sshll.u32 %s208_s1, 6 }
  0x8e   : > { %s3566_s23 = scalar_lea.hbm %s4339_s3, %s2484_s20 }
  0x8f   : > { %s3117_s21 = scalar_lea.hbm %s3566_s23, 16384  ;;  %p3123_p7 = scmp.lt.u32.totalorder %s3566_s23, %s4339_s3 }
  0x90   : > { %p3118_p0 = scmp.ne.s32.totalorder %s3566_s23, %s3117_s21  ;;  %p3124_p11 = scmp.lt.u32.totalorder %s3122_s19, %s3117_s21 }
  0x91   : > { %p3126_p10 = scmp.lt.u32.totalorder %s3117_s21, %s3566_s23 }
  0x92   : > { %p3120_p3 = pnand %p3119_p1, %p3118_p0  ;;  %p3125_p9 = por %p3124_p11, %p3123_p7 }
  0x94   : > { %p3121_p5 = pneg %p3120_p3  ;;  %p3127_p12 = por %p3126_p10, %p3125_p9 }
  0x96   : > { %p3128_p2 = pnand %p3127_p12, %p3121_p5 }
  0x98   : > { %3131 = shalt.err (!%p3128_p2)
}
  0x99   : > { %s3132_s11 = scalar_lea.vmem %s3561_s4, 16384  ;;  %s3284_s17 = smov [#allocation6]  }
  0x9a   : > { %p3133_p8 = scmp.ne.s32.totalorder %s3561_s4, %s3132_s11  ;;  %s3137_s18 = sshll.u32 %s3284_s17, 4  ;;  %s3138_s18 = int_to_ptr.vmem [resolvable:$false] %s3137_s18 }
  0x9b   : > { %s3139_s1 = scalar_lea.vmem %s3138_s18, 32768  ;;  %p3140_p0 = scmp.lt.s32.totalorder %s3561_s4, %s3138_s18 }
  0x9c   : > { %p3135_p4 = pnand %p3133_p8, %p3119_p1  ;;  %p3141_p3 = scmp.lt.s32.totalorder %s3139_s1, %s3132_s11 }
  0x9e   : > { %p3136_p6 = pneg %p3135_p4  ;;  %p3142_p7 = por %p3141_p3, %p3140_p0 }
  0xa0   : > { %p3143_p11 = pnand %p3142_p7, %p3136_p6 }
  0xa2   : > { %3146 = shalt.err (!%p3143_p11)
}
  0xa3   : > { %s3285_s20 = smov 512   ;;  %s3286_s28 = smov 256  }
  0xa4   : > { %s3287_s24 = smov 16   ;;  %p4380_p1 = scmp.ne.s32.totalorder %s4368_s0, 0 }
  0xa5   : > { %2694 = dma.hbm_to_vmem [thread:$0]  (!%p3547_p13), %s3566_s23, 16384, %s3561_s4, %s3570_s22, %s3285_s20, %s3286_s28, %s3287_s24  }
  0xa6   : > { %223 = sbr.rel (%p4380_p1) target bundleno = 829 (0x33d), region = 32  ;;  %s225_s12 = sand.u32 (!%p4380_p1), 1, %s3251_s29  }
  0xa7   : > { %s2486_s21 = sshll.u32 (!%p4380_p1), %s225_s12, 10  ;;  %s226_s6 = scalar_lea.sflag (!%p4380_p1), [#allocation7], %s225_s12 }
  0xa8   : > { %s3601_s16 = scalar_lea.vmem (!%p4380_p1), [#allocation6], %s2486_s21  ;;  %p4381_p5 = scmp.ne.s32.totalorder (!%p4380_p1), %s4364_s14, 0 }
  0xad   : > { %3222 = dma.done.wait (%p4381_p5), %s226_s6, 16384  }
  0xae   : > { %3224 = vsyncadd (%p4381_p5), %s226_s6, 4294950912  ;;  %p4382_p9 = scmp.ne.s32.totalorder %s4363_s13, 0 }
  0xb0   : > { %3226 = dma.done.wait (%p4382_p9), [#allocation10], 32784  }
  0xb1   : > { %3228 = vsyncadd (%p4382_p9), [#allocation10], 4294934512  ;;  %s257_s0 = sand.u32 1, %s3239_s26   ;;  %p2490_p13 = scmp.ne.s32.totalorder %s3259_s2, 0 }
  0xb2   : > { %s2489_s25 = sshll.u32 %s257_s0, 9  ;;  %v3288_v0 = vmov (!%p2490_p13), 0.0  }
  0xb3   : > { %s3614_s4 = scalar_lea.vmem [#allocation12], %s2489_s25  ;;  %271 = sbr.rel (%p2490_p13) target bundleno = 212 (0xd4), region = 48 }
  0xb4   : > { %272 = vst [vmem:[%s3614_s4] sm:$0xff] (!%p2490_p13), %v3288_v0  ;;  %273 = vst [vmem:[%s3614_s4 + $0x8] sm:$0xff] (!%p2490_p13), %v3288_v0 }
  0xb5   : > { %274 = vst [vmem:[%s3614_s4 + $0x10] sm:$0xff] (!%p2490_p13), %v3288_v0  ;;  %275 = vst [vmem:[%s3614_s4 + $0x18] sm:$0xff] (!%p2490_p13), %v3288_v0 }
  0xb6   : > { %276 = vst [vmem:[%s3614_s4 + $0x20] sm:$0xff] (!%p2490_p13), %v3288_v0  ;;  %277 = vst [vmem:[%s3614_s4 + $0x28] sm:$0xff] (!%p2490_p13), %v3288_v0 }
  0xb7   : > { %278 = vst [vmem:[%s3614_s4 + $0x30] sm:$0xff] (!%p2490_p13), %v3288_v0  ;;  %279 = vst [vmem:[%s3614_s4 + $0x38] sm:$0xff] (!%p2490_p13), %v3288_v0 }
  0xb8   : > { %280 = vst [vmem:[%s3614_s4 + $0x40] sm:$0xff] (!%p2490_p13), %v3288_v0  ;;  %281 = vst [vmem:[%s3614_s4 + $0x48] sm:$0xff] (!%p2490_p13), %v3288_v0 }
  0xb9   : > { %282 = vst [vmem:[%s3614_s4 + $0x50] sm:$0xff] (!%p2490_p13), %v3288_v0  ;;  %283 = vst [vmem:[%s3614_s4 + $0x58] sm:$0xff] (!%p2490_p13), %v3288_v0 }
  0xba   : > { %284 = vst [vmem:[%s3614_s4 + $0x60] sm:$0xff] %v3288_v0  ;;  %285 = vst [vmem:[%s3614_s4 + $0x68] sm:$0xff] %v3288_v0 }
  0xbb   : > { %286 = vst [vmem:[%s3614_s4 + $0x70] sm:$0xff] %v3288_v0  ;;  %287 = vst [vmem:[%s3614_s4 + $0x78] sm:$0xff] %v3288_v0 }
  0xbc   : > { %288 = vst [vmem:[%s3614_s4 + $0x80] sm:$0xff] %v3288_v0  ;;  %289 = vst [vmem:[%s3614_s4 + $0x88] sm:$0xff] %v3288_v0 }
  0xbd   : > { %290 = vst [vmem:[%s3614_s4 + $0x90] sm:$0xff] %v3288_v0  ;;  %291 = vst [vmem:[%s3614_s4 + $0x98] sm:$0xff] %v3288_v0 }
  0xbe   : > { %292 = vst [vmem:[%s3614_s4 + $0xa0] sm:$0xff] %v3288_v0  ;;  %293 = vst [vmem:[%s3614_s4 + $0xa8] sm:$0xff] %v3288_v0 }
  0xbf   : > { %294 = vst [vmem:[%s3614_s4 + $0xb0] sm:$0xff] %v3288_v0  ;;  %295 = vst [vmem:[%s3614_s4 + $0xb8] sm:$0xff] %v3288_v0 }
  0xc0   : > { %296 = vst [vmem:[%s3614_s4 + $0xc0] sm:$0xff] %v3288_v0  ;;  %297 = vst [vmem:[%s3614_s4 + $0xc8] sm:$0xff] %v3288_v0 }
  0xc1   : > { %298 = vst [vmem:[%s3614_s4 + $0xd0] sm:$0xff] %v3288_v0  ;;  %299 = vst [vmem:[%s3614_s4 + $0xd8] sm:$0xff] %v3288_v0 }
  0xc2   : > { %300 = vst [vmem:[%s3614_s4 + $0xe0] sm:$0xff] %v3288_v0  ;;  %301 = vst [vmem:[%s3614_s4 + $0xe8] sm:$0xff] %v3288_v0 }
  0xc3   : > { %302 = vst [vmem:[%s3614_s4 + $0xf0] sm:$0xff] %v3288_v0  ;;  %303 = vst [vmem:[%s3614_s4 + $0xf8] sm:$0xff] %v3288_v0 }
  0xc4   : > { %304 = vst [vmem:[%s3614_s4 + $0x100] sm:$0xff] %v3288_v0  ;;  %305 = vst [vmem:[%s3614_s4 + $0x108] sm:$0xff] %v3288_v0 }
  0xc5   : > { %306 = vst [vmem:[%s3614_s4 + $0x110] sm:$0xff] %v3288_v0  ;;  %307 = vst [vmem:[%s3614_s4 + $0x118] sm:$0xff] %v3288_v0 }
  0xc6   : > { %308 = vst [vmem:[%s3614_s4 + $0x120] sm:$0xff] %v3288_v0  ;;  %309 = vst [vmem:[%s3614_s4 + $0x128] sm:$0xff] %v3288_v0 }
  0xc7   : > { %310 = vst [vmem:[%s3614_s4 + $0x130] sm:$0xff] %v3288_v0  ;;  %311 = vst [vmem:[%s3614_s4 + $0x138] sm:$0xff] %v3288_v0 }
  0xc8   : > { %312 = vst [vmem:[%s3614_s4 + $0x140] sm:$0xff] %v3288_v0  ;;  %313 = vst [vmem:[%s3614_s4 + $0x148] sm:$0xff] %v3288_v0 }
  0xc9   : > { %314 = vst [vmem:[%s3614_s4 + $0x150] sm:$0xff] %v3288_v0  ;;  %315 = vst [vmem:[%s3614_s4 + $0x158] sm:$0xff] %v3288_v0 }
  0xca   : > { %316 = vst [vmem:[%s3614_s4 + $0x160] sm:$0xff] %v3288_v0  ;;  %317 = vst [vmem:[%s3614_s4 + $0x168] sm:$0xff] %v3288_v0 }
  0xcb   : > { %318 = vst [vmem:[%s3614_s4 + $0x170] sm:$0xff] %v3288_v0  ;;  %319 = vst [vmem:[%s3614_s4 + $0x178] sm:$0xff] %v3288_v0 }
  0xcc   : > { %320 = vst [vmem:[%s3614_s4 + $0x180] sm:$0xff] %v3288_v0  ;;  %321 = vst [vmem:[%s3614_s4 + $0x188] sm:$0xff] %v3288_v0 }
  0xcd   : > { %322 = vst [vmem:[%s3614_s4 + $0x190] sm:$0xff] %v3288_v0  ;;  %323 = vst [vmem:[%s3614_s4 + $0x198] sm:$0xff] %v3288_v0 }
  0xce   : > { %324 = vst [vmem:[%s3614_s4 + $0x1a0] sm:$0xff] %v3288_v0  ;;  %325 = vst [vmem:[%s3614_s4 + $0x1a8] sm:$0xff] %v3288_v0 }
  0xcf   : > { %326 = vst [vmem:[%s3614_s4 + $0x1b0] sm:$0xff] %v3288_v0  ;;  %327 = vst [vmem:[%s3614_s4 + $0x1b8] sm:$0xff] %v3288_v0 }
  0xd0   : > { %328 = vst [vmem:[%s3614_s4 + $0x1c0] sm:$0xff] %v3288_v0  ;;  %329 = vst [vmem:[%s3614_s4 + $0x1c8] sm:$0xff] %v3288_v0 }
  0xd1   : > { %330 = vst [vmem:[%s3614_s4 + $0x1d0] sm:$0xff] %v3288_v0  ;;  %331 = vst [vmem:[%s3614_s4 + $0x1d8] sm:$0xff] %v3288_v0 }
  0xd2   : > { %332 = vst [vmem:[%s3614_s4 + $0x1e0] sm:$0xff] %v3288_v0  ;;  %333 = vst [vmem:[%s3614_s4 + $0x1e8] sm:$0xff] %v3288_v0 }
  0xd3   : > { %334 = vst [vmem:[%s3614_s4 + $0x1f0] sm:$0xff] %v3288_v0  ;;  %335 = vst [vmem:[%s3614_s4 + $0x1f8] sm:$0xff] %v3288_v0 }
  0xd4 PF: > { %s336_s13 = sld [smem:[#allocation5 + %s3263_s7]] }
  0xda   : > { %p2491_p10 = scmp.ge.s32.totalorder %s3259_s2, %s336_s13 }
  0xdb   : > { %s341_s14 = smul.u32 (!%p2491_p10), 7, %s3263_s7  ;;  %v3289_v1 = vmov (!%p2491_p10), 0   ;;  %v2841_v2 = vld [vmem:[%s3601_s16 + $0x4] ss:$16 sps:$4 sm:$0xff] (!%p2491_p10)   ;;  %v2844_v3 = vld [vmem:[%s3601_s16 + $0xc] ss:$16 sps:$4 sm:$0xff] (!%p2491_p10)  }
  0xdc   : > { %340 = sbr.rel (%p2491_p10) target bundleno = 766 (0x2fe), region = 52  ;;  %1440 = vmatprep.subr.bf16.mxu0 (!%p2491_p10), %v3289_v1  ;;  %1729 = vmatprep.subr.bf16.mxu1 (!%p2491_p10), %v3289_v1  ;;  %v2839_v36 = vld [vmem:[%s3601_s16] ss:$16 sps:$4 sm:$0xff] (!%p2491_p10)   ;;  %v2842_v37 = vld [vmem:[%s3601_s16 + $0x8] ss:$16 sps:$4 sm:$0xff] (!%p2491_p10)  }
  0xdd   : > { %s342_s23 = sadd.s32 (!%p2491_p10), %s3259_s2, %s341_s14  ;;  %1472 = vmatprep.mubr.bf16.mxu0 (!%p2491_p10), %v2841_v2  ;;  %1761 = vmatprep.mubr.bf16.mxu1 (!%p2491_p10), %v2844_v3  ;;  %v2845_v38 = vld [vmem:[%s3601_s16 + $0x24] ss:$16 sps:$4 sm:$0xff] (!%p2491_p10)   ;;  %v2847_v39 = vld [vmem:[%s3601_s16 + $0x2c] ss:$16 sps:$4 sm:$0xff] (!%p2491_p10)   ;;  %v2849_v40 = vld [vmem:[%s3601_s16 + $0x20] ss:$16 sps:$4 sm:$0xff] (!%p2491_p10)  }
  0xde   : > { %s343_s22 = sld [smem:[#allocation3 + %s342_s23]] (!%p2491_p10)  ;;  %v2850_v41 = vld [vmem:[%s3601_s16 + $0x28] ss:$16 sps:$4 sm:$0xff] (!%p2491_p10)   ;;  %v2851_v42 = vld [vmem:[%s3601_s16 + $0x44] ss:$16 sps:$4 sm:$0xff] (!%p2491_p10)  }
  0xdf   : > { %s344_s19 = sld [smem:[#allocation4 + %s342_s23]] (!%p2491_p10)  ;;  %v2853_v43 = vld [vmem:[%s3601_s16 + $0x4c] ss:$16 sps:$4 sm:$0xff] (!%p2491_p10)   ;;  %v2855_v44 = vld [vmem:[%s3601_s16 + $0x40] ss:$16 sps:$4 sm:$0xff] (!%p2491_p10)  }
  0xe0   : > { %v2856_v45 = vld [vmem:[%s3601_s16 + $0x48] ss:$16 sps:$4 sm:$0xff] (!%p2491_p10)   ;;  %v2857_v46 = vld [vmem:[%s3601_s16 + $0x64] ss:$16 sps:$4 sm:$0xff] (!%p2491_p10)   ;;  %v2859_v47 = vld [vmem:[%s3601_s16 + $0x6c] ss:$16 sps:$4 sm:$0xff] (!%p2491_p10)  }
  0xe1   : > { %v2861_v48 = vld [vmem:[%s3601_s16 + $0x60] ss:$16 sps:$4 sm:$0xff] (!%p2491_p10)   ;;  %v2862_v49 = vld [vmem:[%s3601_s16 + $0x68] ss:$16 sps:$4 sm:$0xff] (!%p2491_p10)   ;;  %v2863_v50 = vld [vmem:[%s3601_s16 + $0x84] ss:$16 sps:$4 sm:$0xff] (!%p2491_p10)  }
  0xe2   : > { %v2865_v51 = vld [vmem:[%s3601_s16 + $0x8c] ss:$16 sps:$4 sm:$0xff] (!%p2491_p10)   ;;  %v2867_v52 = vld [vmem:[%s3601_s16 + $0x80] ss:$16 sps:$4 sm:$0xff] (!%p2491_p10)   ;;  %v2868_v53 = vld [vmem:[%s3601_s16 + $0x88] ss:$16 sps:$4 sm:$0xff] (!%p2491_p10)  }
  0xe3   : > { %v2869_v54 = vld [vmem:[%s3601_s16 + $0xa4] ss:$16 sps:$4 sm:$0xff]   ;;  %v2871_v55 = vld [vmem:[%s3601_s16 + $0xac] ss:$16 sps:$4 sm:$0xff]   ;;  %v2873_v56 = vld [vmem:[%s3601_s16 + $0xa0] ss:$16 sps:$4 sm:$0xff]  }
  0xe4   : > { %s2492_s5 = sshll.u32 %s343_s22, 10  ;;  %v2874_v57 = vld [vmem:[%s3601_s16 + $0xa8] ss:$16 sps:$4 sm:$0xff]   ;;  %v2875_v58 = vld [vmem:[%s3601_s16 + $0xc4] ss:$16 sps:$4 sm:$0xff]  }
  0xe5   : > { %s2493_s8 = sshll.u32 %s344_s19, 9  ;;  %v2877_v59 = vld [vmem:[%s3601_s16 + $0xcc] ss:$16 sps:$4 sm:$0xff]   ;;  %v2879_v60 = vld [vmem:[%s3601_s16 + $0xc0] ss:$16 sps:$4 sm:$0xff]  }
  0xe6   : > { %s347_s11 = sadd.s32 %s2493_s8, %s2492_s5  ;;  %v2880_v61 = vld [vmem:[%s3601_s16 + $0xc8] ss:$16 sps:$4 sm:$0xff]   ;;  %v2881_v62 = vld [vmem:[%s3601_s16 + $0xe4] ss:$16 sps:$4 sm:$0xff]   ;;  %v2883_v63 = vld [vmem:[%s3601_s16 + $0xec] ss:$16 sps:$4 sm:$0xff]  }
  0xe7   : > { %s348_s17 = sshra.s32 %s347_s11, 3  ;;  %v2885_v0 = vld [vmem:[%s3601_s16 + $0xe0] ss:$16 sps:$4 sm:$0xff]   ;;  %v2887_v2 = vld [vmem:[%s3601_s16 + $0x104] ss:$16 sps:$4 sm:$0xff]  }
  0xe8   : > { %s2494_s18 = sshll.u32 %s348_s17, 2  ;;  %v2889_v3 = vld [vmem:[%s3601_s16 + $0x10c] ss:$16 sps:$4 sm:$0xff]  }
  0xe9   : > { %s3753_s1 = scalar_lea.vmem [#allocation9], %s2494_s18 }
  0xea   : > { %v2807_v4 = vld [vmem:[%s3753_s1] sm:$0xff]   ;;  %v2809_v6 = vld [vmem:[%s3753_s1 + $0x8] sm:$0xff]   ;;  %v2811_v8 = vld [vmem:[%s3753_s1 + $0x10] sm:$0xff]  }
  0xeb   : > { %v2808_v5 = vld [vmem:[%s3753_s1 + $0x80] sm:$0xff]   ;;  %1441 = vmatpush1.bf16.msra.mxu0 %v2807_v4  ;;  %v2810_v7 = vld [vmem:[%s3753_s1 + $0x88] sm:$0xff]   ;;  %v2812_v9 = vld [vmem:[%s3753_s1 + $0x90] sm:$0xff]  }
  0xec   : > { %1730 = vmatpush1.bf16.msra.mxu1 %v2808_v5  ;;  %1442 = vmatprep.subr.bf16.mxu0 %v3289_v1  ;;  %v2813_v10 = vld [vmem:[%s3753_s1 + $0x18] sm:$0xff]   ;;  %v2815_v12 = vld [vmem:[%s3753_s1 + $0x20] sm:$0xff]   ;;  %v2817_v14 = vld [vmem:[%s3753_s1 + $0x28] sm:$0xff]  }
  0xed   : > { %1731 = vmatprep.subr.bf16.mxu1 %v3289_v1  ;;  %v2814_v11 = vld [vmem:[%s3753_s1 + $0x98] sm:$0xff]   ;;  %v2816_v13 = vld [vmem:[%s3753_s1 + $0xa0] sm:$0xff]   ;;  %v2818_v15 = vld [vmem:[%s3753_s1 + $0xa8] sm:$0xff]  }
  0xee   : > { %v2819_v16 = vld [vmem:[%s3753_s1 + $0x30] sm:$0xff]   ;;  %v2821_v18 = vld [vmem:[%s3753_s1 + $0x38] sm:$0xff]   ;;  %v2823_v20 = vld [vmem:[%s3753_s1 + $0x40] sm:$0xff]  }
  0xef   : > { %1443 = vmatpush1.bf16.msra.mxu0 %v2809_v6  ;;  %v2820_v17 = vld [vmem:[%s3753_s1 + $0xb0] sm:$0xff]   ;;  %v2822_v19 = vld [vmem:[%s3753_s1 + $0xb8] sm:$0xff]   ;;  %v2824_v21 = vld [vmem:[%s3753_s1 + $0xc0] sm:$0xff]  }
  0xf0   : > { %1732 = vmatpush1.bf16.msra.mxu1 %v2810_v7  ;;  %1444 = vmatprep.subr.bf16.mxu0 %v3289_v1  ;;  %v2825_v22 = vld [vmem:[%s3753_s1 + $0x48] sm:$0xff]   ;;  %v2827_v24 = vld [vmem:[%s3753_s1 + $0x50] sm:$0xff]   ;;  %v2829_v26 = vld [vmem:[%s3753_s1 + $0x58] sm:$0xff]  }
  0xf1   : > { %1733 = vmatprep.subr.bf16.mxu1 %v3289_v1  ;;  %v2826_v23 = vld [vmem:[%s3753_s1 + $0xc8] sm:$0xff]   ;;  %v2828_v25 = vld [vmem:[%s3753_s1 + $0xd0] sm:$0xff]   ;;  %v2830_v27 = vld [vmem:[%s3753_s1 + $0xd8] sm:$0xff]  }
  0xf2   : > { %v2831_v28 = vld [vmem:[%s3753_s1 + $0x60] sm:$0xff]   ;;  %v2833_v30 = vld [vmem:[%s3753_s1 + $0x68] sm:$0xff]   ;;  %v2835_v32 = vld [vmem:[%s3753_s1 + $0x70] sm:$0xff]  }
  0xf3   : > { %1445 = vmatpush1.bf16.msra.mxu0 %v2811_v8  ;;  %v2832_v29 = vld [vmem:[%s3753_s1 + $0xe0] sm:$0xff]   ;;  %v2834_v31 = vld [vmem:[%s3753_s1 + $0xe8] sm:$0xff]   ;;  %v2836_v33 = vld [vmem:[%s3753_s1 + $0xf0] sm:$0xff]  }
  0xf4   : > { %1734 = vmatpush1.bf16.msra.mxu1 %v2812_v9  ;;  %1446 = vmatprep.subr.bf16.mxu0 %v3289_v1  ;;  %v2837_v34 = vld [vmem:[%s3753_s1 + $0x78] sm:$0xff]   ;;  %v2891_v4 = vld [vmem:[%s3601_s16 + $0x100] ss:$16 sps:$4 sm:$0xff]   ;;  %v2893_v6 = vld [vmem:[%s3601_s16 + $0x124] ss:$16 sps:$4 sm:$0xff]  }
  0xf5   : > { %1735 = vmatprep.subr.bf16.mxu1 %v3289_v1  ;;  %v2838_v35 = vld [vmem:[%s3753_s1 + $0xf8] sm:$0xff]   ;;  %v2897_v8 = vld [vmem:[%s3601_s16 + $0x120] ss:$16 sps:$4 sm:$0xff]  }
  0xf6   : > { %v2892_v5 = vld [vmem:[%s3601_s16 + $0x108] ss:$16 sps:$4 sm:$0xff]   ;;  %v2895_v7 = vld [vmem:[%s3601_s16 + $0x12c] ss:$16 sps:$4 sm:$0xff]  }
  0xf7   : > { %1447 = vmatpush1.bf16.msra.mxu0 %v2813_v10  ;;  %v2898_v9 = vld [vmem:[%s3601_s16 + $0x128] ss:$16 sps:$4 sm:$0xff]   ;;  %v2899_v10 = vld [vmem:[%s3601_s16 + $0x144] ss:$16 sps:$4 sm:$0xff]  }
  0xf8   : > { %1736 = vmatpush1.bf16.msra.mxu1 %v2814_v11  ;;  %1448 = vmatprep.subr.bf16.mxu0 %v3289_v1  ;;  %v2901_v11 = vld [vmem:[%s3601_s16 + $0x14c] ss:$16 sps:$4 sm:$0xff]  }
  0xf9   : > { %1737 = vmatprep.subr.bf16.mxu1 %v3289_v1 }
  0xfb   : > { %1449 = vmatpush1.bf16.msra.mxu0 %v2815_v12  ;;  %v2903_v12 = vld [vmem:[%s3601_s16 + $0x140] ss:$16 sps:$4 sm:$0xff]  }
  0xfc   : > { %1738 = vmatpush1.bf16.msra.mxu1 %v2816_v13  ;;  %1450 = vmatprep.subr.bf16.mxu0 %v3289_v1  ;;  %v2904_v13 = vld [vmem:[%s3601_s16 + $0x148] ss:$16 sps:$4 sm:$0xff]  }
  0xfd   : > { %1739 = vmatprep.subr.bf16.mxu1 %v3289_v1 }
  0xff   : > { %1451 = vmatpush1.bf16.msra.mxu0 %v2817_v14  ;;  %v2905_v14 = vld [vmem:[%s3601_s16 + $0x164] ss:$16 sps:$4 sm:$0xff]  }
 0x100   : > { %1740 = vmatpush1.bf16.msra.mxu1 %v2818_v15  ;;  %1452 = vmatprep.subr.bf16.mxu0 %v3289_v1  ;;  %v2907_v15 = vld [vmem:[%s3601_s16 + $0x16c] ss:$16 sps:$4 sm:$0xff]  }
 0x101   : > { %1741 = vmatprep.subr.bf16.mxu1 %v3289_v1 }
 0x103   : > { %1453 = vmatpush1.bf16.msra.mxu0 %v2819_v16  ;;  %v2909_v16 = vld [vmem:[%s3601_s16 + $0x160] ss:$16 sps:$4 sm:$0xff]  }
 0x104   : > { %1742 = vmatpush1.bf16.msra.mxu1 %v2820_v17  ;;  %1454 = vmatprep.subr.bf16.mxu0 %v3289_v1  ;;  %v2910_v17 = vld [vmem:[%s3601_s16 + $0x168] ss:$16 sps:$4 sm:$0xff]  }
 0x105   : > { %1743 = vmatprep.subr.bf16.mxu1 %v3289_v1 }
 0x107   : > { %1455 = vmatpush1.bf16.msra.mxu0 %v2821_v18  ;;  %v2911_v18 = vld [vmem:[%s3601_s16 + $0x184] ss:$16 sps:$4 sm:$0xff]  }
 0x108   : > { %1744 = vmatpush1.bf16.msra.mxu1 %v2822_v19  ;;  %1456 = vmatprep.subr.bf16.mxu0 %v3289_v1  ;;  %v2913_v19 = vld [vmem:[%s3601_s16 + $0x18c] ss:$16 sps:$4 sm:$0xff]  }
 0x109   : > { %1745 = vmatprep.subr.bf16.mxu1 %v3289_v1 }
 0x10b   : > { %1457 = vmatpush1.bf16.msra.mxu0 %v2823_v20  ;;  %v2915_v20 = vld [vmem:[%s3601_s16 + $0x180] ss:$16 sps:$4 sm:$0xff]  }
 0x10c   : > { %1746 = vmatpush1.bf16.msra.mxu1 %v2824_v21  ;;  %1458 = vmatprep.subr.bf16.mxu0 %v3289_v1  ;;  %v2916_v21 = vld [vmem:[%s3601_s16 + $0x188] ss:$16 sps:$4 sm:$0xff]  }
 0x10d   : > { %1747 = vmatprep.subr.bf16.mxu1 %v3289_v1 }
 0x10f   : > { %1459 = vmatpush1.bf16.msra.mxu0 %v2825_v22  ;;  %v2917_v22 = vld [vmem:[%s3601_s16 + $0x1a4] ss:$16 sps:$4 sm:$0xff]  }
 0x110   : > { %1748 = vmatpush1.bf16.msra.mxu1 %v2826_v23  ;;  %1460 = vmatprep.subr.bf16.mxu0 %v3289_v1  ;;  %v2919_v23 = vld [vmem:[%s3601_s16 + $0x1ac] ss:$16 sps:$4 sm:$0xff]  }
 0x111   : > { %1749 = vmatprep.subr.bf16.mxu1 %v3289_v1 }
 0x113   : > { %1461 = vmatpush1.bf16.msra.mxu0 %v2827_v24  ;;  %v2921_v24 = vld [vmem:[%s3601_s16 + $0x1a0] ss:$16 sps:$4 sm:$0xff]  }
 0x114   : > { %1750 = vmatpush1.bf16.msra.mxu1 %v2828_v25  ;;  %1462 = vmatprep.subr.bf16.mxu0 %v3289_v1  ;;  %v2922_v25 = vld [vmem:[%s3601_s16 + $0x1a8] ss:$16 sps:$4 sm:$0xff]  }
 0x115   : > { %1751 = vmatprep.subr.bf16.mxu1 %v3289_v1 }
 0x117   : > { %1463 = vmatpush1.bf16.msra.mxu0 %v2829_v26  ;;  %v2923_v26 = vld [vmem:[%s3601_s16 + $0x1c4] ss:$16 sps:$4 sm:$0xff]  }
 0x118   : > { %1752 = vmatpush1.bf16.msra.mxu1 %v2830_v27  ;;  %1464 = vmatprep.subr.bf16.mxu0 %v3289_v1  ;;  %v2925_v27 = vld [vmem:[%s3601_s16 + $0x1cc] ss:$16 sps:$4 sm:$0xff]  }
 0x119   : > { %1753 = vmatprep.subr.bf16.mxu1 %v3289_v1 }
 0x11b   : > { %1465 = vmatpush1.bf16.msra.mxu0 %v2831_v28  ;;  %v2927_v28 = vld [vmem:[%s3601_s16 + $0x1c0] ss:$16 sps:$4 sm:$0xff]  }
 0x11c   : > { %1754 = vmatpush1.bf16.msra.mxu1 %v2832_v29  ;;  %1466 = vmatprep.subr.bf16.mxu0 %v3289_v1  ;;  %v2928_v29 = vld [vmem:[%s3601_s16 + $0x1c8] ss:$16 sps:$4 sm:$0xff]  }
 0x11d   : > { %1755 = vmatprep.subr.bf16.mxu1 %v3289_v1 }
 0x11f   : > { %1467 = vmatpush1.bf16.msra.mxu0 %v2833_v30  ;;  %v2929_v30 = vld [vmem:[%s3601_s16 + $0x1e4] ss:$16 sps:$4 sm:$0xff]  }
 0x120   : > { %1756 = vmatpush1.bf16.msra.mxu1 %v2834_v31  ;;  %1468 = vmatprep.subr.bf16.mxu0 %v3289_v1  ;;  %v2931_v31 = vld [vmem:[%s3601_s16 + $0x1ec] ss:$16 sps:$4 sm:$0xff]  }
 0x121   : > { %1757 = vmatprep.subr.bf16.mxu1 %v3289_v1 }
 0x123   : > { %1469 = vmatpush1.bf16.msra.mxu0 %v2835_v32  ;;  %v2933_v32 = vld [vmem:[%s3601_s16 + $0x1e0] ss:$16 sps:$4 sm:$0xff]  }
 0x124   : > { %1758 = vmatpush1.bf16.msra.mxu1 %v2836_v33  ;;  %1470 = vmatprep.subr.bf16.mxu0 %v3289_v1  ;;  %v2934_v33 = vld [vmem:[%s3601_s16 + $0x1e8] ss:$16 sps:$4 sm:$0xff]  }
 0x125   : > { %1759 = vmatprep.subr.bf16.mxu1 %v3289_v1  ;;  %v2886_v1 = vld [vmem:[%s3601_s16 + $0xe8] ss:$16 sps:$4 sm:$0xff]  }
 0x127   : > { %1471 = vmatpush1.bf16.msra.mxu0 %v2837_v34  ;;  %v2935_v34 = vld [vmem:[%s3601_s16 + $0x204] ss:$16 sps:$4 sm:$0xff]  }
 0x128   : > { %1760 = vmatpush1.bf16.msra.mxu1 %v2838_v35  ;;  %v2937_v35 = vld [vmem:[%s3601_s16 + $0x20c] ss:$16 sps:$4 sm:$0xff]  }
 0x12a   : > { %1473 = vmatmul.mubr.bf16.vlgmr.msra.gmra.mrb[0].mxu0 %v2839_v36  ;;  %v2939_v36 = vld [vmem:[%s3601_s16 + $0x200] ss:$16 sps:$4 sm:$0xff]  }
 0x12b   : > { %1762 = vmatmul.mubr.bf16.vlgmr.msra.gmra.mrb[0].mxu1 %v2842_v37  ;;  %1480 = vmatprep.mubr.bf16.mxu0 %v2845_v38  ;;  %v2940_v37 = vld [vmem:[%s3601_s16 + $0x208] ss:$16 sps:$4 sm:$0xff]   ;;  %v2941_v38 = vld [vmem:[%s3601_s16 + $0x224] ss:$16 sps:$4 sm:$0xff]  }
 0x12c   : > { %1769 = vmatprep.mubr.bf16.mxu1 %v2847_v39  ;;  %v2943_v39 = vld [vmem:[%s3601_s16 + $0x22c] ss:$16 sps:$4 sm:$0xff]  }
 0x132   : > { %1481 = vmatmul.mubr.bf16.gmra.mrb[4].mxu0 %v2849_v40  ;;  %v2945_v40 = vld [vmem:[%s3601_s16 + $0x220] ss:$16 sps:$4 sm:$0xff]  }
 0x133   : > { %1770 = vmatmul.mubr.bf16.gmra.mrb[4].mxu1 %v2850_v41  ;;  %1488 = vmatprep.mubr.bf16.mxu0 %v2851_v42  ;;  %v2946_v41 = vld [vmem:[%s3601_s16 + $0x228] ss:$16 sps:$4 sm:$0xff]   ;;  %v2947_v42 = vld [vmem:[%s3601_s16 + $0x244] ss:$16 sps:$4 sm:$0xff]  }
 0x134   : > { %1777 = vmatprep.mubr.bf16.mxu1 %v2853_v43  ;;  %v2949_v43 = vld [vmem:[%s3601_s16 + $0x24c] ss:$16 sps:$4 sm:$0xff]  }
 0x13a   : > { %1489 = vmatmul.mubr.bf16.gmra.mrb[8].mxu0 %v2855_v44  ;;  %v2951_v44 = vld [vmem:[%s3601_s16 + $0x240] ss:$16 sps:$4 sm:$0xff]  }
 0x13b   : > { %1778 = vmatmul.mubr.bf16.gmra.mrb[8].mxu1 %v2856_v45  ;;  %1496 = vmatprep.mubr.bf16.mxu0 %v2857_v46  ;;  %v2952_v45 = vld [vmem:[%s3601_s16 + $0x248] ss:$16 sps:$4 sm:$0xff]   ;;  %v2953_v46 = vld [vmem:[%s3601_s16 + $0x264] ss:$16 sps:$4 sm:$0xff]  }
 0x13c   : > { %1785 = vmatprep.mubr.bf16.mxu1 %v2859_v47  ;;  %v2955_v47 = vld [vmem:[%s3601_s16 + $0x26c] ss:$16 sps:$4 sm:$0xff]  }
 0x142   : > { %1497 = vmatmul.mubr.bf16.gmra.mrb[12].mxu0 %v2861_v48  ;;  %v2957_v48 = vld [vmem:[%s3601_s16 + $0x260] ss:$16 sps:$4 sm:$0xff]  }
 0x143   : > { %1786 = vmatmul.mubr.bf16.gmra.mrb[12].mxu1 %v2862_v49  ;;  %1504 = vmatprep.mubr.bf16.mxu0 %v2863_v50  ;;  %v2958_v49 = vld [vmem:[%s3601_s16 + $0x268] ss:$16 sps:$4 sm:$0xff]   ;;  %v2959_v50 = vld [vmem:[%s3601_s16 + $0x284] ss:$16 sps:$4 sm:$0xff]  }
 0x144   : > { %1793 = vmatprep.mubr.bf16.mxu1 %v2865_v51  ;;  %v2961_v51 = vld [vmem:[%s3601_s16 + $0x28c] ss:$16 sps:$4 sm:$0xff]  }
 0x14a   : > { %1505 = vmatmul.mubr.bf16.gmra.mrb[16].mxu0 %v2867_v52  ;;  %v2963_v52 = vld [vmem:[%s3601_s16 + $0x280] ss:$16 sps:$4 sm:$0xff]  }
 0x14b   : > { %1794 = vmatmul.mubr.bf16.gmra.mrb[16].mxu1 %v2868_v53  ;;  %1512 = vmatprep.mubr.bf16.mxu0 %v2869_v54  ;;  %v2964_v53 = vld [vmem:[%s3601_s16 + $0x288] ss:$16 sps:$4 sm:$0xff]   ;;  %v2965_v54 = vld [vmem:[%s3601_s16 + $0x2a4] ss:$16 sps:$4 sm:$0xff]  }
 0x14c   : > { %1801 = vmatprep.mubr.bf16.mxu1 %v2871_v55  ;;  %v2967_v55 = vld [vmem:[%s3601_s16 + $0x2ac] ss:$16 sps:$4 sm:$0xff]  }
 0x152   : > { %1513 = vmatmul.mubr.bf16.gmra.mrb[20].mxu0 %v2873_v56  ;;  %v2969_v56 = vld [vmem:[%s3601_s16 + $0x2a0] ss:$16 sps:$4 sm:$0xff]  }
 0x153   : > { %1802 = vmatmul.mubr.bf16.gmra.mrb[20].mxu1 %v2874_v57  ;;  %1520 = vmatprep.mubr.bf16.mxu0 %v2875_v58  ;;  %v2970_v57 = vld [vmem:[%s3601_s16 + $0x2a8] ss:$16 sps:$4 sm:$0xff]   ;;  %v2971_v58 = vld [vmem:[%s3601_s16 + $0x2c4] ss:$16 sps:$4 sm:$0xff]  }
 0x154   : > { %1809 = vmatprep.mubr.bf16.mxu1 %v2877_v59  ;;  %v2973_v59 = vld [vmem:[%s3601_s16 + $0x2cc] ss:$16 sps:$4 sm:$0xff]  }
 0x15a   : > { %1521 = vmatmul.mubr.bf16.gmra.mrb[24].mxu0 %v2879_v60  ;;  %v2975_v60 = vld [vmem:[%s3601_s16 + $0x2c0] ss:$16 sps:$4 sm:$0xff]  }
 0x15b   : > { %1810 = vmatmul.mubr.bf16.gmra.mrb[24].mxu1 %v2880_v61  ;;  %1528 = vmatprep.mubr.bf16.mxu0 %v2881_v62  ;;  %v2976_v61 = vld [vmem:[%s3601_s16 + $0x2c8] ss:$16 sps:$4 sm:$0xff]   ;;  %v2977_v62 = vld [vmem:[%s3601_s16 + $0x2e4] ss:$16 sps:$4 sm:$0xff]  }
 0x15c   : > { %1817 = vmatprep.mubr.bf16.mxu1 %v2883_v63  ;;  %v2979_v63 = vld [vmem:[%s3601_s16 + $0x2ec] ss:$16 sps:$4 sm:$0xff]  }
 0x162   : > { %1529 = vmatmul.mubr.bf16.gmra.mrb[28].mxu0 %v2885_v0  ;;  %v2981_v0 = vld [vmem:[%s3601_s16 + $0x2e0] ss:$16 sps:$4 sm:$0xff]  }
 0x163   : > { %1818 = vmatmul.mubr.bf16.gmra.mrb[28].mxu1 %v2886_v1  ;;  %1536 = vmatprep.mubr.bf16.mxu0 %v2887_v2  ;;  %v2982_v1 = vld [vmem:[%s3601_s16 + $0x2e8] ss:$16 sps:$4 sm:$0xff]   ;;  %v2983_v2 = vld [vmem:[%s3601_s16 + $0x304] ss:$16 sps:$4 sm:$0xff]  }
 0x164   : > { %1825 = vmatprep.mubr.bf16.mxu1 %v2889_v3  ;;  %v2985_v3 = vld [vmem:[%s3601_s16 + $0x30c] ss:$16 sps:$4 sm:$0xff]  }
 0x16a   : > { %1537 = vmatmul.mubr.bf16.gmra.mrb[32].mxu0 %v2891_v4  ;;  %v2987_v4 = vld [vmem:[%s3601_s16 + $0x300] ss:$16 sps:$4 sm:$0xff]  }
 0x16b   : > { %1826 = vmatmul.mubr.bf16.gmra.mrb[32].mxu1 %v2892_v5  ;;  %1544 = vmatprep.mubr.bf16.mxu0 %v2893_v6  ;;  %v2988_v5 = vld [vmem:[%s3601_s16 + $0x308] ss:$16 sps:$4 sm:$0xff]   ;;  %v2989_v6 = vld [vmem:[%s3601_s16 + $0x324] ss:$16 sps:$4 sm:$0xff]  }
 0x16c   : > { %1833 = vmatprep.mubr.bf16.mxu1 %v2895_v7  ;;  %v2991_v7 = vld [vmem:[%s3601_s16 + $0x32c] ss:$16 sps:$4 sm:$0xff]  }
 0x172   : > { %1545 = vmatmul.mubr.bf16.gmra.mrb[36].mxu0 %v2897_v8  ;;  %v2993_v8 = vld [vmem:[%s3601_s16 + $0x320] ss:$16 sps:$4 sm:$0xff]  }
 0x173   : > { %1834 = vmatmul.mubr.bf16.gmra.mrb[36].mxu1 %v2898_v9  ;;  %1552 = vmatprep.mubr.bf16.mxu0 %v2899_v10  ;;  %v2994_v9 = vld [vmem:[%s3601_s16 + $0x328] ss:$16 sps:$4 sm:$0xff]   ;;  %v2995_v10 = vld [vmem:[%s3601_s16 + $0x344] ss:$16 sps:$4 sm:$0xff]  }
 0x174   : > { %1841 = vmatprep.mubr.bf16.mxu1 %v2901_v11  ;;  %v2997_v11 = vld [vmem:[%s3601_s16 + $0x34c] ss:$16 sps:$4 sm:$0xff]  }
 0x17a   : > { %1553 = vmatmul.mubr.bf16.gmra.mrb[40].mxu0 %v2903_v12  ;;  %v2999_v12 = vld [vmem:[%s3601_s16 + $0x340] ss:$16 sps:$4 sm:$0xff]  }
 0x17b   : > { %1842 = vmatmul.mubr.bf16.gmra.mrb[40].mxu1 %v2904_v13  ;;  %1560 = vmatprep.mubr.bf16.mxu0 %v2905_v14  ;;  %v3000_v13 = vld [vmem:[%s3601_s16 + $0x348] ss:$16 sps:$4 sm:$0xff]   ;;  %v3001_v14 = vld [vmem:[%s3601_s16 + $0x364] ss:$16 sps:$4 sm:$0xff]  }
 0x17c   : > { %1849 = vmatprep.mubr.bf16.mxu1 %v2907_v15  ;;  %v3003_v15 = vld [vmem:[%s3601_s16 + $0x36c] ss:$16 sps:$4 sm:$0xff]  }
 0x182   : > { %1561 = vmatmul.mubr.bf16.gmra.mrb[44].mxu0 %v2909_v16 }
 0x183   : > { %1850 = vmatmul.mubr.bf16.gmra.mrb[44].mxu1 %v2910_v17  ;;  %1568 = vmatprep.mubr.bf16.mxu0 %v2911_v18  ;;  %v544_v17 = vld [vmem:[%s3614_s4] sm:$0xff] }
 0x184   : > { %1857 = vmatprep.mubr.bf16.mxu1 %v2913_v19 }
 0x18a   : > { %1569 = vmatmul.mubr.bf16.gmra.mrb[48].mxu0 %v2915_v20  ;;  %v3005_v20 = vld [vmem:[%s3601_s16 + $0x360] ss:$16 sps:$4 sm:$0xff]  }
 0x18b   : > { %1858 = vmatmul.mubr.bf16.gmra.mrb[48].mxu1 %v2916_v21  ;;  %1576 = vmatprep.mubr.bf16.mxu0 %v2917_v22 }
 0x18c   : > { %1865 = vmatprep.mubr.bf16.mxu1 %v2919_v23 }
 0x192   : > { %1577 = vmatmul.mubr.bf16.gmra.mrb[52].mxu0 %v2921_v24  ;;  %v3006_v24 = vld [vmem:[%s3601_s16 + $0x368] ss:$16 sps:$4 sm:$0xff]  }
 0x193   : > { %1866 = vmatmul.mubr.bf16.gmra.mrb[52].mxu1 %v2922_v25  ;;  %1584 = vmatprep.mubr.bf16.mxu0 %v2923_v26  ;;  %v3007_v25 = vld [vmem:[%s3601_s16 + $0x384] ss:$16 sps:$4 sm:$0xff]   ;;  %v545_v26 = vld [vmem:[%s3614_s4 + $0x8] sm:$0xff] }
 0x194   : > { %1873 = vmatprep.mubr.bf16.mxu1 %v2925_v27 }
 0x19a   : > { %1585 = vmatmul.mubr.bf16.gmra.mrb[56].mxu0 %v2927_v28 }
 0x19b   : > { %1874 = vmatmul.mubr.bf16.gmra.mrb[56].mxu1 %v2928_v29  ;;  %1592 = vmatprep.mubr.bf16.mxu0 %v2929_v30  ;;  %v3009_v29 = vld [vmem:[%s3601_s16 + $0x38c] ss:$16 sps:$4 sm:$0xff]  }
 0x19c   : > { %1881 = vmatprep.mubr.bf16.mxu1 %v2931_v31 }
 0x1a2   : > { %1593 = vmatmul.mubr.bf16.gmra.mrb[60].mxu0 %v2933_v32 }
 0x1a3   : > { %1882 = vmatmul.mubr.bf16.gmra.mrb[60].mxu1 %v2934_v33  ;;  %1600 = vmatprep.mubr.bf16.mxu0 %v2935_v34 }
 0x1a4   : > { %1889 = vmatprep.mubr.bf16.mxu1 %v2937_v35  ;;  %v546_v35 = vld [vmem:[%s3614_s4 + $0x10] sm:$0xff] }
 0x1aa   : > { %1601 = vmatmul.mubr.bf16.gmra.mrb[64].mxu0 %v2939_v36 }
 0x1ab   : > { %1890 = vmatmul.mubr.bf16.gmra.mrb[64].mxu1 %v2940_v37  ;;  %1608 = vmatprep.mubr.bf16.mxu0 %v2941_v38  ;;  %v3011_v38 = vld [vmem:[%s3601_s16 + $0x380] ss:$16 sps:$4 sm:$0xff]  }
 0x1ac   : > { %1897 = vmatprep.mubr.bf16.mxu1 %v2943_v39 }
 0x1b2   : > { %1609 = vmatmul.mubr.bf16.gmra.mrb[68].mxu0 %v2945_v40 }
 0x1b3   : > { %1898 = vmatmul.mubr.bf16.gmra.mrb[68].mxu1 %v2946_v41  ;;  %1616 = vmatprep.mubr.bf16.mxu0 %v2947_v42  ;;  %v3012_v42 = vld [vmem:[%s3601_s16 + $0x388] ss:$16 sps:$4 sm:$0xff]  }
 0x1b4   : > { %1905 = vmatprep.mubr.bf16.mxu1 %v2949_v43  ;;  %v3013_v43 = vld [vmem:[%s3601_s16 + $0x3a4] ss:$16 sps:$4 sm:$0xff]  }
 0x1ba   : > { %1617 = vmatmul.mubr.bf16.gmra.mrb[72].mxu0 %v2951_v44  ;;  %v547_v44 = vld [vmem:[%s3614_s4 + $0x18] sm:$0xff] }
 0x1bb   : > { %1906 = vmatmul.mubr.bf16.gmra.mrb[72].mxu1 %v2952_v45  ;;  %1624 = vmatprep.mubr.bf16.mxu0 %v2953_v46 }
 0x1bc   : > { %1913 = vmatprep.mubr.bf16.mxu1 %v2955_v47  ;;  %v3015_v47 = vld [vmem:[%s3601_s16 + $0x3ac] ss:$16 sps:$4 sm:$0xff]  }
 0x1c2   : > { %1625 = vmatmul.mubr.bf16.gmra.mrb[76].mxu0 %v2957_v48 }
 0x1c3   : > { %1914 = vmatmul.mubr.bf16.gmra.mrb[76].mxu1 %v2958_v49  ;;  %1632 = vmatprep.mubr.bf16.mxu0 %v2959_v50 }
 0x1c4   : > { %1921 = vmatprep.mubr.bf16.mxu1 %v2961_v51 }
 0x1ca   : > { %1633 = vmatmul.mubr.bf16.gmra.mrb[80].mxu0 %v2963_v52 }
 0x1cb   : > { %1922 = vmatmul.mubr.bf16.gmra.mrb[80].mxu1 %v2964_v53  ;;  %1640 = vmatprep.mubr.bf16.mxu0 %v2965_v54  ;;  %v548_v53 = vld [vmem:[%s3614_s4 + $0x20] sm:$0xff] }
 0x1cc   : > { %1929 = vmatprep.mubr.bf16.mxu1 %v2967_v55 }
 0x1d2   : > { %1641 = vmatmul.mubr.bf16.gmra.mrb[84].mxu0 %v2969_v56  ;;  %v3017_v56 = vld [vmem:[%s3601_s16 + $0x3a0] ss:$16 sps:$4 sm:$0xff]  }
 0x1d3   : > { %1930 = vmatmul.mubr.bf16.gmra.mrb[84].mxu1 %v2970_v57  ;;  %1648 = vmatprep.mubr.bf16.mxu0 %v2971_v58 }
 0x1d4   : > { %1937 = vmatprep.mubr.bf16.mxu1 %v2973_v59 }
 0x1da   : > { %1649 = vmatmul.mubr.bf16.gmra.mrb[88].mxu0 %v2975_v60  ;;  %v3018_v60 = vld [vmem:[%s3601_s16 + $0x3a8] ss:$16 sps:$4 sm:$0xff]  }
 0x1db   : > { %1938 = vmatmul.mubr.bf16.gmra.mrb[88].mxu1 %v2976_v61  ;;  %1656 = vmatprep.mubr.bf16.mxu0 %v2977_v62  ;;  %v3019_v61 = vld [vmem:[%s3601_s16 + $0x3c4] ss:$16 sps:$4 sm:$0xff]   ;;  %v549_v62 = vld [vmem:[%s3614_s4 + $0x28] sm:$0xff] }
 0x1dc   : > { %1945 = vmatprep.mubr.bf16.mxu1 %v2979_v63 }
 0x1e2   : > { %1657 = vmatmul.mubr.bf16.gmra.mrb[92].mxu0 %v2981_v0 }
 0x1e3   : > { %1946 = vmatmul.mubr.bf16.gmra.mrb[92].mxu1 %v2982_v1  ;;  %1664 = vmatprep.mubr.bf16.mxu0 %v2983_v2  ;;  %v3021_v1 = vld [vmem:[%s3601_s16 + $0x3cc] ss:$16 sps:$4 sm:$0xff]  }
 0x1e4   : > { %1953 = vmatprep.mubr.bf16.mxu1 %v2985_v3 }
 0x1ea   : > { %1665 = vmatmul.mubr.bf16.gmra.mrb[96].mxu0 %v2987_v4 }
 0x1eb   : > { %1954 = vmatmul.mubr.bf16.gmra.mrb[96].mxu1 %v2988_v5  ;;  %1672 = vmatprep.mubr.bf16.mxu0 %v2989_v6 }
 0x1ec   : > { %1961 = vmatprep.mubr.bf16.mxu1 %v2991_v7  ;;  %v550_v7 = vld [vmem:[%s3614_s4 + $0x30] sm:$0xff] }
 0x1f2   : > { %1673 = vmatmul.mubr.bf16.gmra.mrb[100].mxu0 %v2993_v8 }
 0x1f3   : > { %1962 = vmatmul.mubr.bf16.gmra.mrb[100].mxu1 %v2994_v9  ;;  %1680 = vmatprep.mubr.bf16.mxu0 %v2995_v10  ;;  %v3023_v10 = vld [vmem:[%s3601_s16 + $0x3c0] ss:$16 sps:$4 sm:$0xff]  }
 0x1f4   : > { %1969 = vmatprep.mubr.bf16.mxu1 %v2997_v11 }
 0x1fa   : > { %1681 = vmatmul.mubr.bf16.gmra.mrb[104].mxu0 %v2999_v12 }
 0x1fb   : > { %1970 = vmatmul.mubr.bf16.gmra.mrb[104].mxu1 %v3000_v13  ;;  %1688 = vmatprep.mubr.bf16.mxu0 %v3001_v14  ;;  %v3024_v14 = vld [vmem:[%s3601_s16 + $0x3c8] ss:$16 sps:$4 sm:$0xff]  }
 0x1fc   : > { %1977 = vmatprep.mubr.bf16.mxu1 %v3003_v15  ;;  %v3025_v15 = vld [vmem:[%s3601_s16 + $0x3e4] ss:$16 sps:$4 sm:$0xff]  }
 0x1fd   : > { %v1474_v16 = vpop.f32.mrb[0].mxu0 }
 0x1fe   : > { %v1763_v18 = vpop.f32.mrb[0].mxu1  ;;  %v1476_v19 = vpop.f32.mrb[1].mxu0 }
 0x1ff   : > { %v1764_v21 = vadd.f32 %v1763_v18, %v1474_v16  ;;  %v1765_v22 = vpop.f32.mrb[1].mxu1  ;;  %v1477_v23 = vpop.f32.mrb[2].mxu0  ;;  %v551_v16 = vld [vmem:[%s3614_s4 + $0x38] sm:$0xff] }
 0x200   : > { %v1766_v27 = vpop.f32.mrb[2].mxu1  ;;  %v1479_v28 = vpop.f32.mrb[3].mxu0  ;;  %v3027_v19 = vld [vmem:[%s3601_s16 + $0x3ec] ss:$16 sps:$4 sm:$0xff]  }
 0x201   : > { %v2018_v30 = vadd.f32 %v1764_v21, %v544_v17  ;;  %v1767_v31 = vadd.f32 %v1766_v27, %v1477_v23  ;;  %v1768_v32 = vpop.f32.mrb[3].mxu1  ;;  %v3029_v28 = vld [vmem:[%s3601_s16 + $0x3e0] ss:$16 sps:$4 sm:$0xff]  }
 0x202   : > { %1689 = vmatmul.mubr.bf16.gmra.mrb[108].mxu0 %v3005_v20  ;;  %v3030_v32 = vld [vmem:[%s3601_s16 + $0x3e8] ss:$16 sps:$4 sm:$0xff]  }
 0x203   : > { %2082 = vst [vmem:[%s3614_s4] sm:$0xff] %v2018_v30  ;;  %v2019_v33 = vadd.f32 %v1767_v31, %v545_v26  ;;  %1978 = vmatmul.mubr.bf16.gmra.mrb[108].mxu1 %v3006_v24  ;;  %1696 = vmatprep.mubr.bf16.mxu0 %v3007_v25  ;;  %v552_v25 = vld [vmem:[%s3614_s4 + $0x40] sm:$0xff] }
 0x204   : > { %1985 = vmatprep.mubr.bf16.mxu1 %v3009_v29 }
 0x205   : > { %2083 = vst [vmem:[%s3614_s4 + $0x8] sm:$0xff] %v2019_v33  ;;  %v1482_v34 = vpop.f32.mrb[4].mxu0  ;;  %v553_v33 = vld [vmem:[%s3614_s4 + $0x48] sm:$0xff] }
 0x206   : > { %v1771_v36 = vpop.f32.mrb[4].mxu1  ;;  %v1484_v37 = vpop.f32.mrb[5].mxu0 }
 0x207   : > { %v1772_v39 = vadd.f32 %v1771_v36, %v1482_v34  ;;  %v1773_v40 = vpop.f32.mrb[5].mxu1  ;;  %v1485_v41 = vpop.f32.mrb[6].mxu0 }
 0x208   : > { %v1774_v45 = vpop.f32.mrb[6].mxu1  ;;  %v1487_v46 = vpop.f32.mrb[7].mxu0 }
 0x209   : > { %v2020_v48 = vadd.f32 %v1772_v39, %v546_v35  ;;  %v1775_v49 = vadd.f32 %v1774_v45, %v1485_v41  ;;  %v1776_v50 = vpop.f32.mrb[7].mxu1  ;;  %v554_v41 = vld [vmem:[%s3614_s4 + $0x50] sm:$0xff] }
 0x20a   : > { %1697 = vmatmul.mubr.bf16.gmra.mrb[112].mxu0 %v3011_v38 }
 0x20b   : > { %2084 = vst [vmem:[%s3614_s4 + $0x10] sm:$0xff] %v2020_v48  ;;  %v2021_v51 = vadd.f32 %v1775_v49, %v547_v44  ;;  %1986 = vmatmul.mubr.bf16.gmra.mrb[112].mxu1 %v3012_v42  ;;  %1704 = vmatprep.mubr.bf16.mxu0 %v3013_v43 }
 0x20c   : > { %1993 = vmatprep.mubr.bf16.mxu1 %v3015_v47  ;;  %v555_v47 = vld [vmem:[%s3614_s4 + $0x58] sm:$0xff] }
 0x20d   : > { %2085 = vst [vmem:[%s3614_s4 + $0x18] sm:$0xff] %v2021_v51  ;;  %v1490_v52 = vpop.f32.mrb[8].mxu0 }
 0x20e   : > { %v1779_v54 = vpop.f32.mrb[8].mxu1  ;;  %v1492_v55 = vpop.f32.mrb[9].mxu0 }
 0x20f   : > { %v1780_v57 = vadd.f32 %v1779_v54, %v1490_v52  ;;  %v1781_v58 = vpop.f32.mrb[9].mxu1  ;;  %v1493_v59 = vpop.f32.mrb[10].mxu0  ;;  %v556_v55 = vld [vmem:[%s3614_s4 + $0x60] sm:$0xff] }
 0x210   : > { %v1782_v63 = vpop.f32.mrb[10].mxu1  ;;  %v1495_v0 = vpop.f32.mrb[11].mxu0 }
 0x211   : > { %v2022_v2 = vadd.f32 %v1780_v57, %v548_v53  ;;  %v1783_v3 = vadd.f32 %v1782_v63, %v1493_v59  ;;  %v1784_v4 = vpop.f32.mrb[11].mxu1 }
 0x212   : > { %1705 = vmatmul.mubr.bf16.gmra.mrb[116].mxu0 %v3017_v56 }
 0x213   : > { %2086 = vst [vmem:[%s3614_s4 + $0x20] sm:$0xff] %v2022_v2  ;;  %v2023_v5 = vadd.f32 %v1783_v3, %v549_v62  ;;  %1994 = vmatmul.mubr.bf16.gmra.mrb[116].mxu1 %v3018_v60  ;;  %1712 = vmatprep.mubr.bf16.mxu0 %v3019_v61  ;;  %v557_v61 = vld [vmem:[%s3614_s4 + $0x68] sm:$0xff] }
 0x214   : > { %2001 = vmatprep.mubr.bf16.mxu1 %v3021_v1 }
 0x215   : > { %2087 = vst [vmem:[%s3614_s4 + $0x28] sm:$0xff] %v2023_v5  ;;  %v1498_v6 = vpop.f32.mrb[12].mxu0  ;;  %v558_v5 = vld [vmem:[%s3614_s4 + $0x70] sm:$0xff] }
 0x216   : > { %v1787_v8 = vpop.f32.mrb[12].mxu1  ;;  %v1500_v9 = vpop.f32.mrb[13].mxu0 }
 0x217   : > { %v1788_v11 = vadd.f32 %v1787_v8, %v1498_v6  ;;  %v1789_v12 = vpop.f32.mrb[13].mxu1  ;;  %v1501_v13 = vpop.f32.mrb[14].mxu0 }
 0x218   : > { %v1790_v17 = vpop.f32.mrb[14].mxu1  ;;  %v1503_v18 = vpop.f32.mrb[15].mxu0 }
 0x219   : > { %v2024_v20 = vadd.f32 %v1788_v11, %v550_v7  ;;  %v1791_v21 = vadd.f32 %v1790_v17, %v1501_v13  ;;  %v1792_v22 = vpop.f32.mrb[15].mxu1  ;;  %v559_v11 = vld [vmem:[%s3614_s4 + $0x78] sm:$0xff] }
 0x21a   : > { %1713 = vmatmul.mubr.bf16.gmra.mrb[120].mxu0 %v3023_v10 }
 0x21b   : > { %2088 = vst [vmem:[%s3614_s4 + $0x30] sm:$0xff] %v2024_v20  ;;  %v2025_v23 = vadd.f32 %v1791_v21, %v551_v16  ;;  %2002 = vmatmul.mubr.bf16.gmra.mrb[120].mxu1 %v3024_v14  ;;  %1720 = vmatprep.mubr.bf16.mxu0 %v3025_v15 }
 0x21c   : > { %2009 = vmatprep.mubr.bf16.mxu1 %v3027_v19  ;;  %v560_v19 = vld [vmem:[%s3614_s4 + $0x80] sm:$0xff] }
 0x21d   : > { %2089 = vst [vmem:[%s3614_s4 + $0x38] sm:$0xff] %v2025_v23  ;;  %v1506_v24 = vpop.f32.mrb[16].mxu0 }
 0x21e   : > { %v1795_v26 = vpop.f32.mrb[16].mxu1  ;;  %v1508_v27 = vpop.f32.mrb[17].mxu0 }
 0x21f   : > { %v1796_v29 = vadd.f32 %v1795_v26, %v1506_v24  ;;  %v1797_v30 = vpop.f32.mrb[17].mxu1  ;;  %v1509_v31 = vpop.f32.mrb[18].mxu0 }
 0x220   : > { %v1798_v34 = vpop.f32.mrb[18].mxu1  ;;  %v1511_v35 = vpop.f32.mrb[19].mxu0 }
 0x221   : > { %v2026_v36 = vadd.f32 %v1796_v29, %v552_v25  ;;  %v1799_v37 = vadd.f32 %v1798_v34, %v1509_v31  ;;  %v1800_v38 = vpop.f32.mrb[19].mxu1  ;;  %v561_v25 = vld [vmem:[%s3614_s4 + $0x88] sm:$0xff] }
 0x222   : > { %1721 = vmatmul.mubr.bf16.gmra.mrb[124].mxu0 %v3029_v28 }
 0x223   : > { %2090 = vst [vmem:[%s3614_s4 + $0x40] sm:$0xff] %v2026_v36  ;;  %v2027_v39 = vadd.f32 %v1799_v37, %v553_v33  ;;  %2010 = vmatmul.mubr.bf16.gmra.mrb[124].mxu1 %v3030_v32  ;;  %v562_v33 = vld [vmem:[%s3614_s4 + $0x90] sm:$0xff] }
 0x225   : > { %2091 = vst [vmem:[%s3614_s4 + $0x48] sm:$0xff] %v2027_v39  ;;  %v1514_v40 = vpop.f32.mrb[20].mxu0  ;;  %v563_v39 = vld [vmem:[%s3614_s4 + $0x98] sm:$0xff] }
 0x226   : > { %v1803_v42 = vpop.f32.mrb[20].mxu1  ;;  %v1516_v43 = vpop.f32.mrb[21].mxu0 }
 0x227   : > { %v1804_v44 = vadd.f32 %v1803_v42, %v1514_v40  ;;  %v1805_v45 = vpop.f32.mrb[21].mxu1  ;;  %v1517_v46 = vpop.f32.mrb[22].mxu0 }
 0x228   : > { %v1806_v48 = vpop.f32.mrb[22].mxu1  ;;  %v1519_v49 = vpop.f32.mrb[23].mxu0 }
 0x229   : > { %v2028_v50 = vadd.f32 %v1804_v44, %v554_v41  ;;  %v1807_v51 = vadd.f32 %v1806_v48, %v1517_v46  ;;  %v1808_v52 = vpop.f32.mrb[23].mxu1 }
 0x22b   : > { %2092 = vst [vmem:[%s3614_s4 + $0x50] sm:$0xff] %v2028_v50  ;;  %v2029_v53 = vadd.f32 %v1807_v51, %v555_v47  ;;  %v564_v47 = vld [vmem:[%s3614_s4 + $0xa0] sm:$0xff] }
 0x22d   : > { %2093 = vst [vmem:[%s3614_s4 + $0x58] sm:$0xff] %v2029_v53  ;;  %v1522_v54 = vpop.f32.mrb[24].mxu0  ;;  %v565_v53 = vld [vmem:[%s3614_s4 + $0xa8] sm:$0xff] }
 0x22e   : > { %v1811_v56 = vpop.f32.mrb[24].mxu1  ;;  %v1524_v57 = vpop.f32.mrb[25].mxu0 }
 0x22f   : > { %v1812_v58 = vadd.f32 %v1811_v56, %v1522_v54  ;;  %v1813_v59 = vpop.f32.mrb[25].mxu1  ;;  %v1525_v60 = vpop.f32.mrb[26].mxu0 }
 0x230   : > { %v1814_v62 = vpop.f32.mrb[26].mxu1  ;;  %v1527_v63 = vpop.f32.mrb[27].mxu0 }
 0x231   : > { %v2030_v0 = vadd.f32 %v1812_v58, %v556_v55  ;;  %v1815_v1 = vadd.f32 %v1814_v62, %v1525_v60  ;;  %v1816_v2 = vpop.f32.mrb[27].mxu1 }
 0x233   : > { %2094 = vst [vmem:[%s3614_s4 + $0x60] sm:$0xff] %v2030_v0  ;;  %v2031_v3 = vadd.f32 %v1815_v1, %v557_v61  ;;  %v566_v61 = vld [vmem:[%s3614_s4 + $0xb0] sm:$0xff] }
 0x235   : > { %2095 = vst [vmem:[%s3614_s4 + $0x68] sm:$0xff] %v2031_v3  ;;  %v1530_v4 = vpop.f32.mrb[28].mxu0  ;;  %v567_v3 = vld [vmem:[%s3614_s4 + $0xb8] sm:$0xff] }
 0x236   : > { %v1819_v6 = vpop.f32.mrb[28].mxu1  ;;  %v1532_v7 = vpop.f32.mrb[29].mxu0 }
 0x237   : > { %v1820_v8 = vadd.f32 %v1819_v6, %v1530_v4  ;;  %v1821_v9 = vpop.f32.mrb[29].mxu1  ;;  %v1533_v10 = vpop.f32.mrb[30].mxu0 }
 0x238   : > { %v1822_v12 = vpop.f32.mrb[30].mxu1  ;;  %v1535_v13 = vpop.f32.mrb[31].mxu0 }
 0x239   : > { %v2032_v14 = vadd.f32 %v1820_v8, %v558_v5  ;;  %v1823_v15 = vadd.f32 %v1822_v12, %v1533_v10  ;;  %v1824_v16 = vpop.f32.mrb[31].mxu1 }
 0x23b   : > { %2096 = vst [vmem:[%s3614_s4 + $0x70] sm:$0xff] %v2032_v14  ;;  %v2033_v17 = vadd.f32 %v1823_v15, %v559_v11  ;;  %v568_v11 = vld [vmem:[%s3614_s4 + $0xc0] sm:$0xff] }
 0x23d   : > { %2097 = vst [vmem:[%s3614_s4 + $0x78] sm:$0xff] %v2033_v17  ;;  %v1538_v18 = vpop.f32.mrb[32].mxu0  ;;  %v569_v17 = vld [vmem:[%s3614_s4 + $0xc8] sm:$0xff] }
 0x23e   : > { %v1827_v20 = vpop.f32.mrb[32].mxu1  ;;  %v1540_v21 = vpop.f32.mrb[33].mxu0 }
 0x23f   : > { %v1828_v22 = vadd.f32 %v1827_v20, %v1538_v18  ;;  %v1829_v23 = vpop.f32.mrb[33].mxu1  ;;  %v1541_v24 = vpop.f32.mrb[34].mxu0 }
 0x240   : > { %v1830_v26 = vpop.f32.mrb[34].mxu1  ;;  %v1543_v27 = vpop.f32.mrb[35].mxu0 }
 0x241   : > { %v2034_v28 = vadd.f32 %v1828_v22, %v560_v19  ;;  %v1831_v29 = vadd.f32 %v1830_v26, %v1541_v24  ;;  %v1832_v30 = vpop.f32.mrb[35].mxu1 }
 0x243   : > { %2098 = vst [vmem:[%s3614_s4 + $0x80] sm:$0xff] %v2034_v28  ;;  %v2035_v31 = vadd.f32 %v1831_v29, %v561_v25  ;;  %v570_v25 = vld [vmem:[%s3614_s4 + $0xd0] sm:$0xff] }
 0x245   : > { %2099 = vst [vmem:[%s3614_s4 + $0x88] sm:$0xff] %v2035_v31  ;;  %v1546_v32 = vpop.f32.mrb[36].mxu0  ;;  %v571_v31 = vld [vmem:[%s3614_s4 + $0xd8] sm:$0xff] }
 0x246   : > { %v1835_v34 = vpop.f32.mrb[36].mxu1  ;;  %v1548_v35 = vpop.f32.mrb[37].mxu0 }
 0x247   : > { %v1836_v36 = vadd.f32 %v1835_v34, %v1546_v32  ;;  %v1837_v37 = vpop.f32.mrb[37].mxu1  ;;  %v1549_v38 = vpop.f32.mrb[38].mxu0 }
 0x248   : > { %v1838_v40 = vpop.f32.mrb[38].mxu1  ;;  %v1551_v41 = vpop.f32.mrb[39].mxu0 }
 0x249   : > { %v2036_v42 = vadd.f32 %v1836_v36, %v562_v33  ;;  %v1839_v43 = vadd.f32 %v1838_v40, %v1549_v38  ;;  %v1840_v44 = vpop.f32.mrb[39].mxu1 }
 0x24b   : > { %2100 = vst [vmem:[%s3614_s4 + $0x90] sm:$0xff] %v2036_v42  ;;  %v2037_v45 = vadd.f32 %v1839_v43, %v563_v39  ;;  %v572_v39 = vld [vmem:[%s3614_s4 + $0xe0] sm:$0xff] }
 0x24d   : > { %2101 = vst [vmem:[%s3614_s4 + $0x98] sm:$0xff] %v2037_v45  ;;  %v1554_v46 = vpop.f32.mrb[40].mxu0  ;;  %v573_v45 = vld [vmem:[%s3614_s4 + $0xe8] sm:$0xff] }
 0x24e   : > { %v1843_v48 = vpop.f32.mrb[40].mxu1  ;;  %v1556_v49 = vpop.f32.mrb[41].mxu0 }
 0x24f   : > { %v1844_v50 = vadd.f32 %v1843_v48, %v1554_v46  ;;  %v1845_v51 = vpop.f32.mrb[41].mxu1  ;;  %v1557_v52 = vpop.f32.mrb[42].mxu0 }
 0x250   : > { %v1846_v54 = vpop.f32.mrb[42].mxu1  ;;  %v1559_v55 = vpop.f32.mrb[43].mxu0 }
 0x251   : > { %v2038_v56 = vadd.f32 %v1844_v50, %v564_v47  ;;  %v1847_v57 = vadd.f32 %v1846_v54, %v1557_v52  ;;  %v1848_v58 = vpop.f32.mrb[43].mxu1 }
 0x253   : > { %2102 = vst [vmem:[%s3614_s4 + $0xa0] sm:$0xff] %v2038_v56  ;;  %v2039_v59 = vadd.f32 %v1847_v57, %v565_v53  ;;  %v574_v53 = vld [vmem:[%s3614_s4 + $0xf0] sm:$0xff] }
 0x255   : > { %2103 = vst [vmem:[%s3614_s4 + $0xa8] sm:$0xff] %v2039_v59  ;;  %v1562_v60 = vpop.f32.mrb[44].mxu0  ;;  %v575_v59 = vld [vmem:[%s3614_s4 + $0xf8] sm:$0xff] }
 0x256   : > { %v1851_v62 = vpop.f32.mrb[44].mxu1  ;;  %v1564_v63 = vpop.f32.mrb[45].mxu0 }
 0x257   : > { %v1852_v0 = vadd.f32 %v1851_v62, %v1562_v60  ;;  %v1853_v1 = vpop.f32.mrb[45].mxu1  ;;  %v1565_v2 = vpop.f32.mrb[46].mxu0 }
 0x258   : > { %v1854_v4 = vpop.f32.mrb[46].mxu1  ;;  %v1567_v5 = vpop.f32.mrb[47].mxu0 }
 0x259   : > { %v2040_v6 = vadd.f32 %v1852_v0, %v566_v61  ;;  %v1855_v7 = vadd.f32 %v1854_v4, %v1565_v2  ;;  %v1856_v8 = vpop.f32.mrb[47].mxu1 }
 0x25b   : > { %2104 = vst [vmem:[%s3614_s4 + $0xb0] sm:$0xff] %v2040_v6  ;;  %v2041_v9 = vadd.f32 %v1855_v7, %v567_v3  ;;  %v576_v3 = vld [vmem:[%s3614_s4 + $0x100] sm:$0xff] }
 0x25d   : > { %2105 = vst [vmem:[%s3614_s4 + $0xb8] sm:$0xff] %v2041_v9  ;;  %v1570_v10 = vpop.f32.mrb[48].mxu0  ;;  %v577_v9 = vld [vmem:[%s3614_s4 + $0x108] sm:$0xff] }
 0x25e   : > { %v1859_v12 = vpop.f32.mrb[48].mxu1  ;;  %v1572_v13 = vpop.f32.mrb[49].mxu0 }
 0x25f   : > { %v1860_v14 = vadd.f32 %v1859_v12, %v1570_v10  ;;  %v1861_v15 = vpop.f32.mrb[49].mxu1  ;;  %v1573_v16 = vpop.f32.mrb[50].mxu0 }
 0x260   : > { %v1862_v18 = vpop.f32.mrb[50].mxu1  ;;  %v1575_v19 = vpop.f32.mrb[51].mxu0 }
 0x261   : > { %v2042_v20 = vadd.f32 %v1860_v14, %v568_v11  ;;  %v1863_v21 = vadd.f32 %v1862_v18, %v1573_v16  ;;  %v1864_v22 = vpop.f32.mrb[51].mxu1 }
 0x263   : > { %2106 = vst [vmem:[%s3614_s4 + $0xc0] sm:$0xff] %v2042_v20  ;;  %v2043_v23 = vadd.f32 %v1863_v21, %v569_v17  ;;  %v578_v17 = vld [vmem:[%s3614_s4 + $0x110] sm:$0xff] }
 0x265   : > { %2107 = vst [vmem:[%s3614_s4 + $0xc8] sm:$0xff] %v2043_v23  ;;  %v1578_v24 = vpop.f32.mrb[52].mxu0  ;;  %v579_v23 = vld [vmem:[%s3614_s4 + $0x118] sm:$0xff] }
 0x266   : > { %v1867_v26 = vpop.f32.mrb[52].mxu1  ;;  %v1580_v27 = vpop.f32.mrb[53].mxu0 }
 0x267   : > { %v1868_v28 = vadd.f32 %v1867_v26, %v1578_v24  ;;  %v1869_v29 = vpop.f32.mrb[53].mxu1  ;;  %v1581_v30 = vpop.f32.mrb[54].mxu0 }
 0x268   : > { %v1870_v32 = vpop.f32.mrb[54].mxu1  ;;  %v1583_v33 = vpop.f32.mrb[55].mxu0 }
 0x269   : > { %v2044_v34 = vadd.f32 %v1868_v28, %v570_v25  ;;  %v1871_v35 = vadd.f32 %v1870_v32, %v1581_v30  ;;  %v1872_v36 = vpop.f32.mrb[55].mxu1 }
 0x26b   : > { %2108 = vst [vmem:[%s3614_s4 + $0xd0] sm:$0xff] %v2044_v34  ;;  %v2045_v37 = vadd.f32 %v1871_v35, %v571_v31  ;;  %v580_v31 = vld [vmem:[%s3614_s4 + $0x120] sm:$0xff] }
 0x26d   : > { %2109 = vst [vmem:[%s3614_s4 + $0xd8] sm:$0xff] %v2045_v37  ;;  %v1586_v38 = vpop.f32.mrb[56].mxu0  ;;  %v581_v37 = vld [vmem:[%s3614_s4 + $0x128] sm:$0xff] }
 0x26e   : > { %v1875_v40 = vpop.f32.mrb[56].mxu1  ;;  %v1588_v41 = vpop.f32.mrb[57].mxu0 }
 0x26f   : > { %v1876_v42 = vadd.f32 %v1875_v40, %v1586_v38  ;;  %v1877_v43 = vpop.f32.mrb[57].mxu1  ;;  %v1589_v44 = vpop.f32.mrb[58].mxu0 }
 0x270   : > { %v1878_v46 = vpop.f32.mrb[58].mxu1  ;;  %v1591_v47 = vpop.f32.mrb[59].mxu0 }
 0x271   : > { %v2046_v48 = vadd.f32 %v1876_v42, %v572_v39  ;;  %v1879_v49 = vadd.f32 %v1878_v46, %v1589_v44  ;;  %v1880_v50 = vpop.f32.mrb[59].mxu1 }
 0x273   : > { %2110 = vst [vmem:[%s3614_s4 + $0xe0] sm:$0xff] %v2046_v48  ;;  %v2047_v51 = vadd.f32 %v1879_v49, %v573_v45  ;;  %v582_v45 = vld [vmem:[%s3614_s4 + $0x130] sm:$0xff] }
 0x275   : > { %2111 = vst [vmem:[%s3614_s4 + $0xe8] sm:$0xff] %v2047_v51  ;;  %v1594_v52 = vpop.f32.mrb[60].mxu0  ;;  %v583_v51 = vld [vmem:[%s3614_s4 + $0x138] sm:$0xff] }
 0x276   : > { %v1883_v54 = vpop.f32.mrb[60].mxu1  ;;  %v1596_v55 = vpop.f32.mrb[61].mxu0 }
 0x277   : > { %v1884_v56 = vadd.f32 %v1883_v54, %v1594_v52  ;;  %v1885_v57 = vpop.f32.mrb[61].mxu1  ;;  %v1597_v58 = vpop.f32.mrb[62].mxu0 }
 0x278   : > { %v1886_v60 = vpop.f32.mrb[62].mxu1  ;;  %v1599_v61 = vpop.f32.mrb[63].mxu0 }
 0x279   : > { %v2048_v62 = vadd.f32 %v1884_v56, %v574_v53  ;;  %v1887_v63 = vadd.f32 %v1886_v60, %v1597_v58  ;;  %v1888_v0 = vpop.f32.mrb[63].mxu1 }
 0x27b   : > { %2112 = vst [vmem:[%s3614_s4 + $0xf0] sm:$0xff] %v2048_v62  ;;  %v2049_v1 = vadd.f32 %v1887_v63, %v575_v59  ;;  %v584_v59 = vld [vmem:[%s3614_s4 + $0x140] sm:$0xff] }
 0x27d   : > { %2113 = vst [vmem:[%s3614_s4 + $0xf8] sm:$0xff] %v2049_v1  ;;  %v1602_v2 = vpop.f32.mrb[64].mxu0  ;;  %v585_v1 = vld [vmem:[%s3614_s4 + $0x148] sm:$0xff] }
 0x27e   : > { %v1891_v4 = vpop.f32.mrb[64].mxu1  ;;  %v1604_v5 = vpop.f32.mrb[65].mxu0 }
 0x27f   : > { %v1892_v6 = vadd.f32 %v1891_v4, %v1602_v2  ;;  %v1893_v7 = vpop.f32.mrb[65].mxu1  ;;  %v1605_v8 = vpop.f32.mrb[66].mxu0 }
 0x280   : > { %v1894_v10 = vpop.f32.mrb[66].mxu1  ;;  %v1607_v11 = vpop.f32.mrb[67].mxu0 }
 0x281   : > { %v2050_v12 = vadd.f32 %v1892_v6, %v576_v3  ;;  %v1895_v13 = vadd.f32 %v1894_v10, %v1605_v8  ;;  %v1896_v14 = vpop.f32.mrb[67].mxu1 }
 0x283   : > { %2114 = vst [vmem:[%s3614_s4 + $0x100] sm:$0xff] %v2050_v12  ;;  %v2051_v15 = vadd.f32 %v1895_v13, %v577_v9  ;;  %v586_v9 = vld [vmem:[%s3614_s4 + $0x150] sm:$0xff] }
 0x285   : > { %2115 = vst [vmem:[%s3614_s4 + $0x108] sm:$0xff] %v2051_v15  ;;  %v1610_v16 = vpop.f32.mrb[68].mxu0  ;;  %v587_v15 = vld [vmem:[%s3614_s4 + $0x158] sm:$0xff] }
 0x286   : > { %v1899_v18 = vpop.f32.mrb[68].mxu1  ;;  %v1612_v19 = vpop.f32.mrb[69].mxu0 }
 0x287   : > { %v1900_v20 = vadd.f32 %v1899_v18, %v1610_v16  ;;  %v1901_v21 = vpop.f32.mrb[69].mxu1  ;;  %v1613_v22 = vpop.f32.mrb[70].mxu0 }
 0x288   : > { %v1902_v24 = vpop.f32.mrb[70].mxu1  ;;  %v1615_v25 = vpop.f32.mrb[71].mxu0 }
 0x289   : > { %v2052_v26 = vadd.f32 %v1900_v20, %v578_v17  ;;  %v1903_v27 = vadd.f32 %v1902_v24, %v1613_v22  ;;  %v1904_v28 = vpop.f32.mrb[71].mxu1 }
 0x28b   : > { %2116 = vst [vmem:[%s3614_s4 + $0x110] sm:$0xff] %v2052_v26  ;;  %v2053_v29 = vadd.f32 %v1903_v27, %v579_v23  ;;  %v588_v23 = vld [vmem:[%s3614_s4 + $0x160] sm:$0xff] }
 0x28d   : > { %2117 = vst [vmem:[%s3614_s4 + $0x118] sm:$0xff] %v2053_v29  ;;  %v1618_v30 = vpop.f32.mrb[72].mxu0  ;;  %v589_v29 = vld [vmem:[%s3614_s4 + $0x168] sm:$0xff] }
 0x28e   : > { %v1907_v32 = vpop.f32.mrb[72].mxu1  ;;  %v1620_v33 = vpop.f32.mrb[73].mxu0 }
 0x28f   : > { %v1908_v34 = vadd.f32 %v1907_v32, %v1618_v30  ;;  %v1909_v35 = vpop.f32.mrb[73].mxu1  ;;  %v1621_v36 = vpop.f32.mrb[74].mxu0 }
 0x290   : > { %v1910_v38 = vpop.f32.mrb[74].mxu1  ;;  %v1623_v39 = vpop.f32.mrb[75].mxu0 }
 0x291   : > { %v2054_v40 = vadd.f32 %v1908_v34, %v580_v31  ;;  %v1911_v41 = vadd.f32 %v1910_v38, %v1621_v36  ;;  %v1912_v42 = vpop.f32.mrb[75].mxu1 }
 0x293   : > { %2118 = vst [vmem:[%s3614_s4 + $0x120] sm:$0xff] %v2054_v40  ;;  %v2055_v43 = vadd.f32 %v1911_v41, %v581_v37  ;;  %v590_v37 = vld [vmem:[%s3614_s4 + $0x170] sm:$0xff] }
 0x295   : > { %2119 = vst [vmem:[%s3614_s4 + $0x128] sm:$0xff] %v2055_v43  ;;  %v1626_v44 = vpop.f32.mrb[76].mxu0  ;;  %v591_v43 = vld [vmem:[%s3614_s4 + $0x178] sm:$0xff] }
 0x296   : > { %v1915_v46 = vpop.f32.mrb[76].mxu1  ;;  %v1628_v47 = vpop.f32.mrb[77].mxu0 }
 0x297   : > { %v1916_v48 = vadd.f32 %v1915_v46, %v1626_v44  ;;  %v1917_v49 = vpop.f32.mrb[77].mxu1  ;;  %v1629_v50 = vpop.f32.mrb[78].mxu0 }
 0x298   : > { %v1918_v52 = vpop.f32.mrb[78].mxu1  ;;  %v1631_v53 = vpop.f32.mrb[79].mxu0 }
 0x299   : > { %v2056_v54 = vadd.f32 %v1916_v48, %v582_v45  ;;  %v1919_v55 = vadd.f32 %v1918_v52, %v1629_v50  ;;  %v1920_v56 = vpop.f32.mrb[79].mxu1 }
 0x29b   : > { %2120 = vst [vmem:[%s3614_s4 + $0x130] sm:$0xff] %v2056_v54  ;;  %v2057_v57 = vadd.f32 %v1919_v55, %v583_v51  ;;  %v592_v51 = vld [vmem:[%s3614_s4 + $0x180] sm:$0xff] }
 0x29d   : > { %2121 = vst [vmem:[%s3614_s4 + $0x138] sm:$0xff] %v2057_v57  ;;  %v1634_v58 = vpop.f32.mrb[80].mxu0  ;;  %v593_v57 = vld [vmem:[%s3614_s4 + $0x188] sm:$0xff] }
 0x29e   : > { %v1923_v60 = vpop.f32.mrb[80].mxu1  ;;  %v1636_v61 = vpop.f32.mrb[81].mxu0 }
 0x29f   : > { %v1924_v62 = vadd.f32 %v1923_v60, %v1634_v58  ;;  %v1925_v63 = vpop.f32.mrb[81].mxu1  ;;  %v1637_v0 = vpop.f32.mrb[82].mxu0 }
 0x2a0   : > { %v1926_v2 = vpop.f32.mrb[82].mxu1  ;;  %v1639_v3 = vpop.f32.mrb[83].mxu0 }
 0x2a1   : > { %v2058_v4 = vadd.f32 %v1924_v62, %v584_v59  ;;  %v1927_v5 = vadd.f32 %v1926_v2, %v1637_v0  ;;  %v1928_v6 = vpop.f32.mrb[83].mxu1 }
 0x2a3   : > { %2122 = vst [vmem:[%s3614_s4 + $0x140] sm:$0xff] %v2058_v4  ;;  %v2059_v7 = vadd.f32 %v1927_v5, %v585_v1  ;;  %v594_v1 = vld [vmem:[%s3614_s4 + $0x190] sm:$0xff] }
 0x2a5   : > { %2123 = vst [vmem:[%s3614_s4 + $0x148] sm:$0xff] %v2059_v7  ;;  %v1642_v8 = vpop.f32.mrb[84].mxu0  ;;  %v595_v7 = vld [vmem:[%s3614_s4 + $0x198] sm:$0xff] }
 0x2a6   : > { %v1931_v10 = vpop.f32.mrb[84].mxu1  ;;  %v1644_v11 = vpop.f32.mrb[85].mxu0 }
 0x2a7   : > { %v1932_v12 = vadd.f32 %v1931_v10, %v1642_v8  ;;  %v1933_v13 = vpop.f32.mrb[85].mxu1  ;;  %v1645_v14 = vpop.f32.mrb[86].mxu0 }
 0x2a8   : > { %v1934_v16 = vpop.f32.mrb[86].mxu1  ;;  %v1647_v17 = vpop.f32.mrb[87].mxu0 }
 0x2a9   : > { %v2060_v18 = vadd.f32 %v1932_v12, %v586_v9  ;;  %v1935_v19 = vadd.f32 %v1934_v16, %v1645_v14  ;;  %v1936_v20 = vpop.f32.mrb[87].mxu1 }
 0x2ab   : > { %2124 = vst [vmem:[%s3614_s4 + $0x150] sm:$0xff] %v2060_v18  ;;  %v2061_v21 = vadd.f32 %v1935_v19, %v587_v15  ;;  %v596_v15 = vld [vmem:[%s3614_s4 + $0x1a0] sm:$0xff] }
 0x2ad   : > { %2125 = vst [vmem:[%s3614_s4 + $0x158] sm:$0xff] %v2061_v21  ;;  %v1650_v22 = vpop.f32.mrb[88].mxu0  ;;  %v597_v21 = vld [vmem:[%s3614_s4 + $0x1a8] sm:$0xff] }
 0x2ae   : > { %v1939_v24 = vpop.f32.mrb[88].mxu1  ;;  %v1652_v25 = vpop.f32.mrb[89].mxu0 }
 0x2af   : > { %v1940_v26 = vadd.f32 %v1939_v24, %v1650_v22  ;;  %v1941_v27 = vpop.f32.mrb[89].mxu1  ;;  %v1653_v28 = vpop.f32.mrb[90].mxu0 }
 0x2b0   : > { %v1942_v30 = vpop.f32.mrb[90].mxu1  ;;  %v1655_v31 = vpop.f32.mrb[91].mxu0 }
 0x2b1   : > { %v2062_v32 = vadd.f32 %v1940_v26, %v588_v23  ;;  %v1943_v33 = vadd.f32 %v1942_v30, %v1653_v28  ;;  %v1944_v34 = vpop.f32.mrb[91].mxu1 }
 0x2b3   : > { %2126 = vst [vmem:[%s3614_s4 + $0x160] sm:$0xff] %v2062_v32  ;;  %v2063_v35 = vadd.f32 %v1943_v33, %v589_v29  ;;  %v598_v29 = vld [vmem:[%s3614_s4 + $0x1b0] sm:$0xff] }
 0x2b5   : > { %2127 = vst [vmem:[%s3614_s4 + $0x168] sm:$0xff] %v2063_v35  ;;  %v1658_v36 = vpop.f32.mrb[92].mxu0  ;;  %v599_v35 = vld [vmem:[%s3614_s4 + $0x1b8] sm:$0xff] }
 0x2b6   : > { %v1947_v38 = vpop.f32.mrb[92].mxu1  ;;  %v1660_v39 = vpop.f32.mrb[93].mxu0 }
 0x2b7   : > { %v1948_v40 = vadd.f32 %v1947_v38, %v1658_v36  ;;  %v1949_v41 = vpop.f32.mrb[93].mxu1  ;;  %v1661_v42 = vpop.f32.mrb[94].mxu0 }
 0x2b8   : > { %v1950_v44 = vpop.f32.mrb[94].mxu1  ;;  %v1663_v45 = vpop.f32.mrb[95].mxu0 }
 0x2b9   : > { %v2064_v46 = vadd.f32 %v1948_v40, %v590_v37  ;;  %v1951_v47 = vadd.f32 %v1950_v44, %v1661_v42  ;;  %v1952_v48 = vpop.f32.mrb[95].mxu1 }
 0x2bb   : > { %2128 = vst [vmem:[%s3614_s4 + $0x170] sm:$0xff] %v2064_v46  ;;  %v2065_v49 = vadd.f32 %v1951_v47, %v591_v43  ;;  %v600_v43 = vld [vmem:[%s3614_s4 + $0x1c0] sm:$0xff] }
 0x2bd   : > { %2129 = vst [vmem:[%s3614_s4 + $0x178] sm:$0xff] %v2065_v49  ;;  %v1666_v50 = vpop.f32.mrb[96].mxu0  ;;  %v601_v49 = vld [vmem:[%s3614_s4 + $0x1c8] sm:$0xff] }
 0x2be   : > { %v1955_v52 = vpop.f32.mrb[96].mxu1  ;;  %v1668_v53 = vpop.f32.mrb[97].mxu0 }
 0x2bf   : > { %v1956_v54 = vadd.f32 %v1955_v52, %v1666_v50  ;;  %v1957_v55 = vpop.f32.mrb[97].mxu1  ;;  %v1669_v56 = vpop.f32.mrb[98].mxu0 }
 0x2c0   : > { %v1958_v58 = vpop.f32.mrb[98].mxu1  ;;  %v1671_v59 = vpop.f32.mrb[99].mxu0 }
 0x2c1   : > { %v2066_v60 = vadd.f32 %v1956_v54, %v592_v51  ;;  %v1959_v61 = vadd.f32 %v1958_v58, %v1669_v56  ;;  %v1960_v62 = vpop.f32.mrb[99].mxu1 }
 0x2c3   : > { %2130 = vst [vmem:[%s3614_s4 + $0x180] sm:$0xff] %v2066_v60  ;;  %v2067_v63 = vadd.f32 %v1959_v61, %v593_v57  ;;  %v602_v57 = vld [vmem:[%s3614_s4 + $0x1d0] sm:$0xff] }
 0x2c5   : > { %2131 = vst [vmem:[%s3614_s4 + $0x188] sm:$0xff] %v2067_v63  ;;  %v1674_v0 = vpop.f32.mrb[100].mxu0  ;;  %v603_v63 = vld [vmem:[%s3614_s4 + $0x1d8] sm:$0xff] }
 0x2c6   : > { %v1963_v2 = vpop.f32.mrb[100].mxu1  ;;  %v1676_v3 = vpop.f32.mrb[101].mxu0 }
 0x2c7   : > { %v1964_v4 = vadd.f32 %v1963_v2, %v1674_v0  ;;  %v1965_v5 = vpop.f32.mrb[101].mxu1  ;;  %v1677_v6 = vpop.f32.mrb[102].mxu0 }
 0x2c8   : > { %v1966_v8 = vpop.f32.mrb[102].mxu1  ;;  %v1679_v9 = vpop.f32.mrb[103].mxu0 }
 0x2c9   : > { %v2068_v10 = vadd.f32 %v1964_v4, %v594_v1  ;;  %v1967_v11 = vadd.f32 %v1966_v8, %v1677_v6  ;;  %v1968_v12 = vpop.f32.mrb[103].mxu1 }
 0x2cb   : > { %2132 = vst [vmem:[%s3614_s4 + $0x190] sm:$0xff] %v2068_v10  ;;  %v2069_v13 = vadd.f32 %v1967_v11, %v595_v7  ;;  %v604_v7 = vld [vmem:[%s3614_s4 + $0x1e0] sm:$0xff] }
 0x2cd   : > { %2133 = vst [vmem:[%s3614_s4 + $0x198] sm:$0xff] %v2069_v13  ;;  %v1682_v14 = vpop.f32.mrb[104].mxu0  ;;  %v605_v13 = vld [vmem:[%s3614_s4 + $0x1e8] sm:$0xff] }
 0x2ce   : > { %v1971_v16 = vpop.f32.mrb[104].mxu1  ;;  %v1684_v17 = vpop.f32.mrb[105].mxu0 }
 0x2cf   : > { %v1972_v18 = vadd.f32 %v1971_v16, %v1682_v14  ;;  %v1973_v19 = vpop.f32.mrb[105].mxu1  ;;  %v1685_v20 = vpop.f32.mrb[106].mxu0 }
 0x2d0   : > { %v1974_v22 = vpop.f32.mrb[106].mxu1  ;;  %v1687_v23 = vpop.f32.mrb[107].mxu0 }
 0x2d1   : > { %v2070_v24 = vadd.f32 %v1972_v18, %v596_v15  ;;  %v1975_v25 = vadd.f32 %v1974_v22, %v1685_v20  ;;  %v1976_v26 = vpop.f32.mrb[107].mxu1 }
 0x2d3   : > { %2134 = vst [vmem:[%s3614_s4 + $0x1a0] sm:$0xff] %v2070_v24  ;;  %v2071_v27 = vadd.f32 %v1975_v25, %v597_v21  ;;  %v606_v21 = vld [vmem:[%s3614_s4 + $0x1f0] sm:$0xff] }
 0x2d5   : > { %2135 = vst [vmem:[%s3614_s4 + $0x1a8] sm:$0xff] %v2071_v27  ;;  %v1690_v28 = vpop.f32.mrb[108].mxu0  ;;  %v607_v27 = vld [vmem:[%s3614_s4 + $0x1f8] sm:$0xff] }
 0x2d6   : > { %v1979_v30 = vpop.f32.mrb[108].mxu1  ;;  %v1692_v31 = vpop.f32.mrb[109].mxu0 }
 0x2d7   : > { %v1980_v32 = vadd.f32 %v1979_v30, %v1690_v28  ;;  %v1981_v33 = vpop.f32.mrb[109].mxu1  ;;  %v1693_v34 = vpop.f32.mrb[110].mxu0 }
 0x2d8   : > { %v1982_v36 = vpop.f32.mrb[110].mxu1  ;;  %v1695_v37 = vpop.f32.mrb[111].mxu0 }
 0x2d9   : > { %v2072_v38 = vadd.f32 %v1980_v32, %v598_v29  ;;  %v1983_v39 = vadd.f32 %v1982_v36, %v1693_v34  ;;  %v1984_v40 = vpop.f32.mrb[111].mxu1 }
 0x2db   : > { %2136 = vst [vmem:[%s3614_s4 + $0x1b0] sm:$0xff] %v2072_v38  ;;  %v2073_v41 = vadd.f32 %v1983_v39, %v599_v35 }
 0x2dd   : > { %2137 = vst [vmem:[%s3614_s4 + $0x1b8] sm:$0xff] %v2073_v41  ;;  %v1698_v42 = vpop.f32.mrb[112].mxu0 }
 0x2de   : > { %v1987_v44 = vpop.f32.mrb[112].mxu1  ;;  %v1700_v45 = vpop.f32.mrb[113].mxu0 }
 0x2df   : > { %v1988_v46 = vadd.f32 %v1987_v44, %v1698_v42  ;;  %v1989_v47 = vpop.f32.mrb[113].mxu1  ;;  %v1701_v48 = vpop.f32.mrb[114].mxu0 }
 0x2e0   : > { %v1990_v50 = vpop.f32.mrb[114].mxu1  ;;  %v1703_v51 = vpop.f32.mrb[115].mxu0 }
 0x2e1   : > { %v2074_v52 = vadd.f32 %v1988_v46, %v600_v43  ;;  %v1991_v53 = vadd.f32 %v1990_v50, %v1701_v48  ;;  %v1992_v54 = vpop.f32.mrb[115].mxu1 }
 0x2e3   : > { %2138 = vst [vmem:[%s3614_s4 + $0x1c0] sm:$0xff] %v2074_v52  ;;  %v2075_v55 = vadd.f32 %v1991_v53, %v601_v49 }
 0x2e5   : > { %2139 = vst [vmem:[%s3614_s4 + $0x1c8] sm:$0xff] %v2075_v55  ;;  %v1706_v56 = vpop.f32.mrb[116].mxu0 }
 0x2e6   : > { %v1995_v58 = vpop.f32.mrb[116].mxu1  ;;  %v1708_v59 = vpop.f32.mrb[117].mxu0 }
 0x2e7   : > { %v1996_v60 = vadd.f32 %v1995_v58, %v1706_v56  ;;  %v1997_v61 = vpop.f32.mrb[117].mxu1  ;;  %v1709_v62 = vpop.f32.mrb[118].mxu0 }
 0x2e8   : > { %v1998_v0 = vpop.f32.mrb[118].mxu1  ;;  %v1711_v1 = vpop.f32.mrb[119].mxu0 }
 0x2e9   : > { %v2076_v2 = vadd.f32 %v1996_v60, %v602_v57  ;;  %v1999_v3 = vadd.f32 %v1998_v0, %v1709_v62  ;;  %v2000_v4 = vpop.f32.mrb[119].mxu1 }
 0x2eb   : > { %2140 = vst [vmem:[%s3614_s4 + $0x1d0] sm:$0xff] %v2076_v2  ;;  %v2077_v5 = vadd.f32 %v1999_v3, %v603_v63 }
 0x2ed   : > { %2141 = vst [vmem:[%s3614_s4 + $0x1d8] sm:$0xff] %v2077_v5  ;;  %v1714_v6 = vpop.f32.mrb[120].mxu0 }
 0x2ee   : > { %v2003_v8 = vpop.f32.mrb[120].mxu1  ;;  %v1716_v9 = vpop.f32.mrb[121].mxu0 }
 0x2ef   : > { %v2004_v10 = vadd.f32 %v2003_v8, %v1714_v6  ;;  %v2005_v11 = vpop.f32.mrb[121].mxu1  ;;  %v1717_v12 = vpop.f32.mrb[122].mxu0 }
 0x2f0   : > { %v2006_v14 = vpop.f32.mrb[122].mxu1  ;;  %v1719_v15 = vpop.f32.mrb[123].mxu0 }
 0x2f1   : > { %v2078_v16 = vadd.f32 %v2004_v10, %v604_v7  ;;  %v2007_v17 = vadd.f32 %v2006_v14, %v1717_v12  ;;  %v2008_v18 = vpop.f32.mrb[123].mxu1 }
 0x2f3   : > { %2142 = vst [vmem:[%s3614_s4 + $0x1e0] sm:$0xff] %v2078_v16  ;;  %v2079_v19 = vadd.f32 %v2007_v17, %v605_v13 }
 0x2f5   : > { %2143 = vst [vmem:[%s3614_s4 + $0x1e8] sm:$0xff] %v2079_v19  ;;  %v1722_v20 = vpop.f32.mrb[124].mxu0 }
 0x2f6   : > { %v2011_v22 = vpop.f32.mrb[124].mxu1  ;;  %v1724_v23 = vpop.f32.mrb[125].mxu0 }
 0x2f7   : > { %v2012_v24 = vadd.f32 %v2011_v22, %v1722_v20  ;;  %v2013_v25 = vpop.f32.mrb[125].mxu1  ;;  %v1725_v26 = vpop.f32.mrb[126].mxu0 }
 0x2f8   : > { %v2014_v28 = vpop.f32.mrb[126].mxu1  ;;  %v1727_v29 = vpop.f32.mrb[127].mxu0 }
 0x2f9   : > { %v2080_v30 = vadd.f32 %v2012_v24, %v606_v21  ;;  %v2015_v31 = vadd.f32 %v2014_v28, %v1725_v26  ;;  %v2016_v32 = vpop.f32.mrb[127].mxu1 }
 0x2fb   : > { %2144 = vst [vmem:[%s3614_s4 + $0x1f0] sm:$0xff] %v2080_v30  ;;  %v2081_v33 = vadd.f32 %v2015_v31, %v607_v27 }
 0x2fd   : > { %2145 = vst [vmem:[%s3614_s4 + $0x1f8] sm:$0xff] %v2081_v33 }
 0x2fe PF: > { %p2655_p12 = scmp.ne.s32.totalorder %s3259_s2, 6 }
 0x2ff   : > { %v2150_v34 = vld [vmem:[%s3614_s4] sm:$0xff] (!%p2655_p12)  ;;  %v4073_v35 = vld [vmem:[#allocation11] ss:$0 sm:$0xff] (!%p2655_p12)  ;;  %v2151_v36 = vld [vmem:[%s3614_s4 + $0x8] sm:$0xff] (!%p2655_p12) }
 0x300   : > { %2149 = sbr.rel (%p2655_p12) target bundleno = 802 (0x322), region = 56  ;;  %v2221_v37 = vadd.f32 (!%p2655_p12), %v4073_v35, %v2150_v34  ;;  %v2222_v38 = vadd.f32 (!%p2655_p12), %v4073_v35, %v2151_v36  ;;  %v2152_v39 = vld [vmem:[%s3614_s4 + $0x10] sm:$0xff] (!%p2655_p12)  ;;  %v2153_v40 = vld [vmem:[%s3614_s4 + $0x18] sm:$0xff] (!%p2655_p12)  ;;  %v2154_v41 = vld [vmem:[%s3614_s4 + $0x20] sm:$0xff] (!%p2655_p12) }
 0x301   : > { %v2223_v42 = vadd.f32 (!%p2655_p12), %v4073_v35, %v2152_v39  ;;  %v2224_v43 = vadd.f32 (!%p2655_p12), %v4073_v35, %v2153_v40  ;;  %v2225_v44 = vadd.f32 (!%p2655_p12), %v4073_v35, %v2154_v41  ;;  %v2155_v45 = vld [vmem:[%s3614_s4 + $0x28] sm:$0xff] (!%p2655_p12)  ;;  %v2156_v46 = vld [vmem:[%s3614_s4 + $0x30] sm:$0xff] (!%p2655_p12)  ;;  %v2157_v47 = vld [vmem:[%s3614_s4 + $0x38] sm:$0xff] (!%p2655_p12) }
 0x302   : > { %2285 = vst [vmem:[%s3614_s4] sm:$0xff] (!%p2655_p12), %v2221_v37  ;;  %2286 = vst [vmem:[%s3614_s4 + $0x8] sm:$0xff] (!%p2655_p12), %v2222_v38  ;;  %v2226_v48 = vadd.f32 (!%p2655_p12), %v4073_v35, %v2155_v45  ;;  %v2227_v49 = vadd.f32 (!%p2655_p12), %v4073_v35, %v2156_v46  ;;  %v2228_v50 = vadd.f32 (!%p2655_p12), %v4073_v35, %v2157_v47  ;;  %v2158_v51 = vld [vmem:[%s3614_s4 + $0x40] sm:$0xff] (!%p2655_p12)  ;;  %v2159_v52 = vld [vmem:[%s3614_s4 + $0x48] sm:$0xff] (!%p2655_p12) }
 0x303   : > { %v2160_v53 = vld [vmem:[%s3614_s4 + $0x50] sm:$0xff] (!%p2655_p12)  ;;  %2287 = vst [vmem:[%s3614_s4 + $0x10] sm:$0xff] (!%p2655_p12), %v2223_v42  ;;  %2288 = vst [vmem:[%s3614_s4 + $0x18] sm:$0xff] (!%p2655_p12), %v2224_v43  ;;  %v2229_v54 = vadd.f32 (!%p2655_p12), %v4073_v35, %v2158_v51  ;;  %v2230_v55 = vadd.f32 (!%p2655_p12), %v4073_v35, %v2159_v52  ;;  %v2161_v57 = vld [vmem:[%s3614_s4 + $0x58] sm:$0xff] (!%p2655_p12) }
 0x304   : > { %2289 = vst [vmem:[%s3614_s4 + $0x20] sm:$0xff] (!%p2655_p12), %v2225_v44  ;;  %v2231_v56 = vadd.f32 (!%p2655_p12), %v4073_v35, %v2160_v53  ;;  %v2162_v58 = vld [vmem:[%s3614_s4 + $0x60] sm:$0xff] (!%p2655_p12)  ;;  %v2163_v59 = vld [vmem:[%s3614_s4 + $0x68] sm:$0xff] (!%p2655_p12)  ;;  %2290 = vst [vmem:[%s3614_s4 + $0x28] sm:$0xff] (!%p2655_p12), %v2226_v48  ;;  %v2232_v60 = vadd.f32 (!%p2655_p12), %v4073_v35, %v2161_v57 }
 0x305   : > { %2291 = vst [vmem:[%s3614_s4 + $0x30] sm:$0xff] (!%p2655_p12), %v2227_v49  ;;  %2292 = vst [vmem:[%s3614_s4 + $0x38] sm:$0xff] (!%p2655_p12), %v2228_v50  ;;  %v2233_v61 = vadd.f32 (!%p2655_p12), %v4073_v35, %v2162_v58  ;;  %v2234_v62 = vadd.f32 (!%p2655_p12), %v4073_v35, %v2163_v59  ;;  %v2164_v63 = vld [vmem:[%s3614_s4 + $0x70] sm:$0xff] (!%p2655_p12)  ;;  %v2165_v0 = vld [vmem:[%s3614_s4 + $0x78] sm:$0xff] (!%p2655_p12) }
 0x306   : > { %v2166_v1 = vld [vmem:[%s3614_s4 + $0x80] sm:$0xff] (!%p2655_p12)  ;;  %2293 = vst [vmem:[%s3614_s4 + $0x40] sm:$0xff] (!%p2655_p12), %v2229_v54  ;;  %2294 = vst [vmem:[%s3614_s4 + $0x48] sm:$0xff] (!%p2655_p12), %v2230_v55  ;;  %v2235_v2 = vadd.f32 (!%p2655_p12), %v4073_v35, %v2164_v63  ;;  %v2236_v3 = vadd.f32 (!%p2655_p12), %v4073_v35, %v2165_v0  ;;  %v2167_v5 = vld [vmem:[%s3614_s4 + $0x88] sm:$0xff] (!%p2655_p12) }
 0x307   : > { %2295 = vst [vmem:[%s3614_s4 + $0x50] sm:$0xff] %v2231_v56  ;;  %v2237_v4 = vadd.f32 %v4073_v35, %v2166_v1  ;;  %v2168_v6 = vld [vmem:[%s3614_s4 + $0x90] sm:$0xff]  ;;  %v2169_v7 = vld [vmem:[%s3614_s4 + $0x98] sm:$0xff]  ;;  %2296 = vst [vmem:[%s3614_s4 + $0x58] sm:$0xff] %v2232_v60  ;;  %v2238_v8 = vadd.f32 %v4073_v35, %v2167_v5 }
 0x308   : > { %2297 = vst [vmem:[%s3614_s4 + $0x60] sm:$0xff] %v2233_v61  ;;  %2298 = vst [vmem:[%s3614_s4 + $0x68] sm:$0xff] %v2234_v62  ;;  %v2239_v9 = vadd.f32 %v4073_v35, %v2168_v6  ;;  %v2240_v10 = vadd.f32 %v4073_v35, %v2169_v7  ;;  %v2170_v11 = vld [vmem:[%s3614_s4 + $0xa0] sm:$0xff]  ;;  %v2171_v12 = vld [vmem:[%s3614_s4 + $0xa8] sm:$0xff] }
 0x309   : > { %v2172_v13 = vld [vmem:[%s3614_s4 + $0xb0] sm:$0xff]  ;;  %2299 = vst [vmem:[%s3614_s4 + $0x70] sm:$0xff] %v2235_v2  ;;  %2300 = vst [vmem:[%s3614_s4 + $0x78] sm:$0xff] %v2236_v3  ;;  %v2241_v14 = vadd.f32 %v4073_v35, %v2170_v11  ;;  %v2242_v15 = vadd.f32 %v4073_v35, %v2171_v12  ;;  %v2173_v17 = vld [vmem:[%s3614_s4 + $0xb8] sm:$0xff] }
 0x30a   : > { %2301 = vst [vmem:[%s3614_s4 + $0x80] sm:$0xff] %v2237_v4  ;;  %v2243_v16 = vadd.f32 %v4073_v35, %v2172_v13  ;;  %v2174_v18 = vld [vmem:[%s3614_s4 + $0xc0] sm:$0xff]  ;;  %v2175_v19 = vld [vmem:[%s3614_s4 + $0xc8] sm:$0xff]  ;;  %2302 = vst [vmem:[%s3614_s4 + $0x88] sm:$0xff] %v2238_v8  ;;  %v2244_v20 = vadd.f32 %v4073_v35, %v2173_v17 }
 0x30b   : > { %2303 = vst [vmem:[%s3614_s4 + $0x90] sm:$0xff] %v2239_v9  ;;  %2304 = vst [vmem:[%s3614_s4 + $0x98] sm:$0xff] %v2240_v10  ;;  %v2245_v21 = vadd.f32 %v4073_v35, %v2174_v18  ;;  %v2246_v22 = vadd.f32 %v4073_v35, %v2175_v19  ;;  %v2176_v23 = vld [vmem:[%s3614_s4 + $0xd0] sm:$0xff]  ;;  %v2177_v24 = vld [vmem:[%s3614_s4 + $0xd8] sm:$0xff] }
 0x30c   : > { %v2178_v25 = vld [vmem:[%s3614_s4 + $0xe0] sm:$0xff]  ;;  %2305 = vst [vmem:[%s3614_s4 + $0xa0] sm:$0xff] %v2241_v14  ;;  %2306 = vst [vmem:[%s3614_s4 + $0xa8] sm:$0xff] %v2242_v15  ;;  %v2247_v26 = vadd.f32 %v4073_v35, %v2176_v23  ;;  %v2248_v27 = vadd.f32 %v4073_v35, %v2177_v24  ;;  %v2179_v29 = vld [vmem:[%s3614_s4 + $0xe8] sm:$0xff] }
 0x30d   : > { %2307 = vst [vmem:[%s3614_s4 + $0xb0] sm:$0xff] %v2243_v16  ;;  %v2249_v28 = vadd.f32 %v4073_v35, %v2178_v25  ;;  %v2180_v30 = vld [vmem:[%s3614_s4 + $0xf0] sm:$0xff]  ;;  %v2181_v31 = vld [vmem:[%s3614_s4 + $0xf8] sm:$0xff]  ;;  %2308 = vst [vmem:[%s3614_s4 + $0xb8] sm:$0xff] %v2244_v20  ;;  %v2250_v32 = vadd.f32 %v4073_v35, %v2179_v29 }
 0x30e   : > { %2309 = vst [vmem:[%s3614_s4 + $0xc0] sm:$0xff] %v2245_v21  ;;  %2310 = vst [vmem:[%s3614_s4 + $0xc8] sm:$0xff] %v2246_v22  ;;  %v2251_v33 = vadd.f32 %v4073_v35, %v2180_v30  ;;  %v2252_v34 = vadd.f32 %v4073_v35, %v2181_v31  ;;  %v2182_v36 = vld [vmem:[%s3614_s4 + $0x100] sm:$0xff]  ;;  %v2183_v37 = vld [vmem:[%s3614_s4 + $0x108] sm:$0xff] }
 0x30f   : > { %v2184_v38 = vld [vmem:[%s3614_s4 + $0x110] sm:$0xff]  ;;  %2311 = vst [vmem:[%s3614_s4 + $0xd0] sm:$0xff] %v2247_v26  ;;  %2312 = vst [vmem:[%s3614_s4 + $0xd8] sm:$0xff] %v2248_v27  ;;  %v2253_v39 = vadd.f32 %v4073_v35, %v2182_v36  ;;  %v2254_v40 = vadd.f32 %v4073_v35, %v2183_v37  ;;  %v2185_v42 = vld [vmem:[%s3614_s4 + $0x118] sm:$0xff] }
 0x310   : > { %2313 = vst [vmem:[%s3614_s4 + $0xe0] sm:$0xff] %v2249_v28  ;;  %v2255_v41 = vadd.f32 %v4073_v35, %v2184_v38  ;;  %v2186_v43 = vld [vmem:[%s3614_s4 + $0x120] sm:$0xff]  ;;  %v2187_v44 = vld [vmem:[%s3614_s4 + $0x128] sm:$0xff]  ;;  %2314 = vst [vmem:[%s3614_s4 + $0xe8] sm:$0xff] %v2250_v32  ;;  %v2256_v45 = vadd.f32 %v4073_v35, %v2185_v42 }
 0x311   : > { %2315 = vst [vmem:[%s3614_s4 + $0xf0] sm:$0xff] %v2251_v33  ;;  %2316 = vst [vmem:[%s3614_s4 + $0xf8] sm:$0xff] %v2252_v34  ;;  %v2257_v46 = vadd.f32 %v4073_v35, %v2186_v43  ;;  %v2258_v47 = vadd.f32 %v4073_v35, %v2187_v44  ;;  %v2188_v48 = vld [vmem:[%s3614_s4 + $0x130] sm:$0xff]  ;;  %v2189_v49 = vld [vmem:[%s3614_s4 + $0x138] sm:$0xff] }
 0x312   : > { %v2190_v50 = vld [vmem:[%s3614_s4 + $0x140] sm:$0xff]  ;;  %2317 = vst [vmem:[%s3614_s4 + $0x100] sm:$0xff] %v2253_v39  ;;  %2318 = vst [vmem:[%s3614_s4 + $0x108] sm:$0xff] %v2254_v40  ;;  %v2259_v51 = vadd.f32 %v4073_v35, %v2188_v48  ;;  %v2260_v52 = vadd.f32 %v4073_v35, %v2189_v49  ;;  %v2191_v54 = vld [vmem:[%s3614_s4 + $0x148] sm:$0xff] }
 0x313   : > { %2319 = vst [vmem:[%s3614_s4 + $0x110] sm:$0xff] %v2255_v41  ;;  %v2261_v53 = vadd.f32 %v4073_v35, %v2190_v50  ;;  %v2192_v55 = vld [vmem:[%s3614_s4 + $0x150] sm:$0xff]  ;;  %v2193_v56 = vld [vmem:[%s3614_s4 + $0x158] sm:$0xff]  ;;  %2320 = vst [vmem:[%s3614_s4 + $0x118] sm:$0xff] %v2256_v45  ;;  %v2262_v57 = vadd.f32 %v4073_v35, %v2191_v54 }
 0x314   : > { %2321 = vst [vmem:[%s3614_s4 + $0x120] sm:$0xff] %v2257_v46  ;;  %2322 = vst [vmem:[%s3614_s4 + $0x128] sm:$0xff] %v2258_v47  ;;  %v2263_v58 = vadd.f32 %v4073_v35, %v2192_v55  ;;  %v2264_v59 = vadd.f32 %v4073_v35, %v2193_v56  ;;  %v2194_v60 = vld [vmem:[%s3614_s4 + $0x160] sm:$0xff]  ;;  %v2195_v61 = vld [vmem:[%s3614_s4 + $0x168] sm:$0xff] }
 0x315   : > { %v2196_v62 = vld [vmem:[%s3614_s4 + $0x170] sm:$0xff]  ;;  %2323 = vst [vmem:[%s3614_s4 + $0x130] sm:$0xff] %v2259_v51  ;;  %2324 = vst [vmem:[%s3614_s4 + $0x138] sm:$0xff] %v2260_v52  ;;  %v2265_v63 = vadd.f32 %v4073_v35, %v2194_v60  ;;  %v2266_v0 = vadd.f32 %v4073_v35, %v2195_v61  ;;  %v2197_v2 = vld [vmem:[%s3614_s4 + $0x178] sm:$0xff] }
 0x316   : > { %2325 = vst [vmem:[%s3614_s4 + $0x140] sm:$0xff] %v2261_v53  ;;  %v2267_v1 = vadd.f32 %v4073_v35, %v2196_v62  ;;  %v2198_v3 = vld [vmem:[%s3614_s4 + $0x180] sm:$0xff]  ;;  %v2199_v4 = vld [vmem:[%s3614_s4 + $0x188] sm:$0xff]  ;;  %2326 = vst [vmem:[%s3614_s4 + $0x148] sm:$0xff] %v2262_v57  ;;  %v2268_v5 = vadd.f32 %v4073_v35, %v2197_v2 }
 0x317   : > { %2327 = vst [vmem:[%s3614_s4 + $0x150] sm:$0xff] %v2263_v58  ;;  %2328 = vst [vmem:[%s3614_s4 + $0x158] sm:$0xff] %v2264_v59  ;;  %v2269_v6 = vadd.f32 %v4073_v35, %v2198_v3  ;;  %v2270_v7 = vadd.f32 %v4073_v35, %v2199_v4  ;;  %v2200_v8 = vld [vmem:[%s3614_s4 + $0x190] sm:$0xff]  ;;  %v2201_v9 = vld [vmem:[%s3614_s4 + $0x198] sm:$0xff] }
 0x318   : > { %v2202_v10 = vld [vmem:[%s3614_s4 + $0x1a0] sm:$0xff]  ;;  %2329 = vst [vmem:[%s3614_s4 + $0x160] sm:$0xff] %v2265_v63  ;;  %2330 = vst [vmem:[%s3614_s4 + $0x168] sm:$0xff] %v2266_v0  ;;  %v2271_v11 = vadd.f32 %v4073_v35, %v2200_v8  ;;  %v2272_v12 = vadd.f32 %v4073_v35, %v2201_v9  ;;  %v2203_v14 = vld [vmem:[%s3614_s4 + $0x1a8] sm:$0xff] }
 0x319   : > { %2331 = vst [vmem:[%s3614_s4 + $0x170] sm:$0xff] %v2267_v1  ;;  %v2273_v13 = vadd.f32 %v4073_v35, %v2202_v10  ;;  %v2204_v15 = vld [vmem:[%s3614_s4 + $0x1b0] sm:$0xff]  ;;  %v2205_v16 = vld [vmem:[%s3614_s4 + $0x1b8] sm:$0xff]  ;;  %2332 = vst [vmem:[%s3614_s4 + $0x178] sm:$0xff] %v2268_v5  ;;  %v2274_v17 = vadd.f32 %v4073_v35, %v2203_v14 }
 0x31a   : > { %2333 = vst [vmem:[%s3614_s4 + $0x180] sm:$0xff] %v2269_v6  ;;  %2334 = vst [vmem:[%s3614_s4 + $0x188] sm:$0xff] %v2270_v7  ;;  %v2275_v18 = vadd.f32 %v4073_v35, %v2204_v15  ;;  %v2276_v19 = vadd.f32 %v4073_v35, %v2205_v16  ;;  %v2206_v20 = vld [vmem:[%s3614_s4 + $0x1c0] sm:$0xff]  ;;  %v2207_v21 = vld [vmem:[%s3614_s4 + $0x1c8] sm:$0xff] }
 0x31b   : > { %v2208_v22 = vld [vmem:[%s3614_s4 + $0x1d0] sm:$0xff]  ;;  %2335 = vst [vmem:[%s3614_s4 + $0x190] sm:$0xff] %v2271_v11  ;;  %2336 = vst [vmem:[%s3614_s4 + $0x198] sm:$0xff] %v2272_v12  ;;  %v2277_v23 = vadd.f32 %v4073_v35, %v2206_v20  ;;  %v2278_v24 = vadd.f32 %v4073_v35, %v2207_v21  ;;  %v2209_v26 = vld [vmem:[%s3614_s4 + $0x1d8] sm:$0xff] }
 0x31c   : > { %2337 = vst [vmem:[%s3614_s4 + $0x1a0] sm:$0xff] %v2273_v13  ;;  %v2279_v25 = vadd.f32 %v4073_v35, %v2208_v22  ;;  %v2210_v27 = vld [vmem:[%s3614_s4 + $0x1e0] sm:$0xff]  ;;  %v2211_v28 = vld [vmem:[%s3614_s4 + $0x1e8] sm:$0xff]  ;;  %2338 = vst [vmem:[%s3614_s4 + $0x1a8] sm:$0xff] %v2274_v17  ;;  %v2280_v29 = vadd.f32 %v4073_v35, %v2209_v26 }
 0x31d   : > { %2339 = vst [vmem:[%s3614_s4 + $0x1b0] sm:$0xff] %v2275_v18  ;;  %2340 = vst [vmem:[%s3614_s4 + $0x1b8] sm:$0xff] %v2276_v19  ;;  %v2281_v30 = vadd.f32 %v4073_v35, %v2210_v27  ;;  %v2282_v31 = vadd.f32 %v4073_v35, %v2211_v28  ;;  %v2212_v32 = vld [vmem:[%s3614_s4 + $0x1f0] sm:$0xff]  ;;  %v2213_v33 = vld [vmem:[%s3614_s4 + $0x1f8] sm:$0xff] }
 0x31e   : > { %2341 = vst [vmem:[%s3614_s4 + $0x1c0] sm:$0xff] %v2277_v23  ;;  %2342 = vst [vmem:[%s3614_s4 + $0x1c8] sm:$0xff] %v2278_v24  ;;  %v2283_v34 = vadd.f32 %v4073_v35, %v2212_v32  ;;  %v2284_v36 = vadd.f32 %v4073_v35, %v2213_v33 }
 0x31f   : > { %2343 = vst [vmem:[%s3614_s4 + $0x1d0] sm:$0xff] %v2279_v25  ;;  %2344 = vst [vmem:[%s3614_s4 + $0x1d8] sm:$0xff] %v2280_v29 }
 0x320   : > { %2345 = vst [vmem:[%s3614_s4 + $0x1e0] sm:$0xff] %v2281_v30  ;;  %2346 = vst [vmem:[%s3614_s4 + $0x1e8] sm:$0xff] %v2282_v31 }
 0x321   : > { %2347 = vst [vmem:[%s3614_s4 + $0x1f0] sm:$0xff] %v2283_v34  ;;  %2348 = vst [vmem:[%s3614_s4 + $0x1f8] sm:$0xff] %v2284_v36 }
 0x322 PF: > { %s2663_s2 = sshll.u32 %s3263_s7, 13  ;;  %s4383_s24 = sld [smem:[#allocation30_spill]] }
 0x323   : > { %s2363_s21 = sshll.u32 %s3614_s4, 4  ;;  %s4277_s6 = scalar_lea.sflag [#allocation8], %s257_s0  ;;  %s4273_s21 = int_to_ptr.vmem [resolvable:$true] %s2363_s21 }
 0x324   : > { %s3147_s16 = scalar_lea.vmem %s4273_s21, 8192  ;;  %p4384_p8 = scmp.ne.s32.totalorder %s4365_s15, 0 }
 0x325   : > { %p3148_p2 = scmp.ne.s32.totalorder %s4273_s21, %s3147_s16  ;;  %s3290_s7 = smov [#allocation12]  }
 0x326   : > { %s3151_s25 = sshll.u32 %s3290_s7, 4  ;;  %s3152_s25 = int_to_ptr.vmem [resolvable:$false] %s3151_s25 }
 0x327   : > { %p3149_p4 = pnand %p3148_p2, %p4384_p8  ;;  %s3153_s13 = scalar_lea.vmem %s3152_s25, 16384 }
 0x328   : > { %s4270_s12 = scalar_lea.hbm %s4383_s24, %s2663_s2  ;;  %p3154_p0 = scmp.lt.s32.totalorder %s4273_s21, %s3152_s25 }
 0x329   : > { %p3150_p6 = pneg %p3149_p4  ;;  %p3155_p3 = scmp.lt.s32.totalorder %s3153_s13, %s3147_s16 }
 0x32b   : > { %p3156_p7 = por %p3155_p3, %p3154_p0 }
 0x32d   : > { %p3157_p11 = pnand %p3156_p7, %p3150_p6 }
 0x32f   : > { %3160 = shalt.err (!%p3157_p11)
}
 0x330   : > { %s3161_s0 = scalar_lea.hbm %s4270_s12, 8192  ;;  %s3165_s23 = scalar_lea.hbm %s4383_s24, 16384 }
 0x331   : > { %p3162_p1 = scmp.ne.s32.totalorder %s4270_s12, %s3161_s0  ;;  %p3166_p13 = scmp.lt.u32.totalorder %s4270_s12, %s4383_s24 }
 0x332   : > { %p3167_p10 = scmp.lt.u32.totalorder %s3165_s23, %s3161_s0  ;;  %p3169_p2 = scmp.lt.u32.totalorder %s3161_s0, %s4270_s12 }
 0x333   : > { %p3163_p5 = pnand %p3162_p1, %p4384_p8 }
 0x334   : > { %p3168_p12 = por %p3167_p10, %p3166_p13 }
 0x335   : > { %p3164_p9 = pneg %p3163_p5 }
 0x336   : > { %p3170_p4 = por %p3169_p2, %p3168_p12 }
 0x338   : > { %p3171_p6 = pnand %p3170_p4, %p3164_p9 }
 0x33a   : > { %3174 = shalt.err (!%p3171_p6)
}
 0x33b   : > { %s3291_s5 = smov 128   ;;  %s3292_s8 = smov 8  }
 0x33c   : > { %2678 = dma.vmem_to_hbm [thread:$0]  (%p4384_p8), %s4273_s21, 8192, %s4270_s12, %s4277_s6, %s3291_s5, %s3291_s5, %s3292_s8  }
 0x33d PF: > { %s4385_s11 = sld [smem:[#allocation21_spill]]  ;;  %s4386_s17 = sld [smem:[#allocation24_spill]] }
 0x33e   : > { %p2704_p0 = scmp.ge.s32.totalorder %s3275_s10, 2 }
 0x343   : > { %s2378_s18 = sand.u32 1, %s4385_s11   ;;  %p4387_p3 = scmp.ne.s32.totalorder %s4386_s17, 0 }
 0x344   : > { %s2379_s1 = scalar_lea.sflag [#allocation8], %s2378_s18 }
 0x345   : > { %p2696_p7 = pnand %p2704_p0, %p4387_p3 }
 0x347   : > { %3230 = dma.done.wait (!%p2696_p7), %s2379_s1, 8192  }
 0x348   : > { %3232 = vsyncadd (!%p2696_p7), %s2379_s1, 4294959104  ;;  %s31_s10 = sadd.s32 1, %s3275_s10   ;;  %s4388_s2 = sld [smem:[#allocation22_spill]] }
 0x349   : > { %p28_p11 = scmp.ge.s32.totalorder %s31_s10, 16   ;;  %s4389_s20 = sld [smem:[#allocation27_spill]] }
 0x34a   : > { %s4390_s15 = smov %s3556_s27  ;;  %s4391_s12 = sld [smem:[#allocation23_spill]] }
 0x34b   : > { %s4392_s8 = sld [smem:[#allocation25_spill]]  ;;  %s4393_s21 = sld [smem:[#allocation26_spill]] }
 0x34c   : > { %s4394_s1 = smov %s3239_s26  ;;  %s4397_s28 = smov %s3251_s29 }
 0x34d   : > { %s4398_s29 = smov %s3255_s30  ;;  %s4399_s30 = smov %s4390_s15 }
 0x34e   : > { %s4395_s26 = smov %s4388_s2  ;;  %s4401_s7 = smov %s3271_s9 }
 0x34f   : > { %s4396_s27 = smov %s4389_s20  ;;  %30 = sbr.rel (!%p28_p11) target bundleno = 37 (0x25), region = 98 }
 0x350   : > { %s4400_s2 = smov %s4391_s12 }
 0x351   : > { %s4402_s9 = smov %s4393_s21 }
 0x356   :  { %2384 = vsyncpa [#allocation7], 1 }
 0x357   :  { %2386 = vsyncpa [#allocation7 + $0x1], 1 }
 0x358   :  { %2387 = vsyncpa [#allocation10], 1 }
 0x359   :  { %2388 = vsyncpa [#allocation8], 1 }
 0x35a   :  { %2390 = vsyncpa [#allocation8 + $0x1], 1 }

</bundles_post_ra>
